<compile_context>
chip_gen: v7x
topology: tpu7x:2x2x1
jax: 0.10.0
libtpu: 0.0.40
codegen_flags: <defaults>
</compile_context>

<pallas_src>
import jax
import jax.numpy as jnp
from jax.experimental import pallas as pl
from jax.experimental.pallas import tpu as pltpu


def _round_up(x, m):
    return ((x + m - 1) // m) * m


# ----------------------------- kernels --------------------------------------


def _ffwd_kernel_f32out(x_ref, w1_ref, b1_ref, w2_ref, b2_ref, o_ref):
    # x_ref: (tm, C)   w1_ref: (C, th) bf16   b1_ref: (1, th) f32
    # w2_ref: (th, C) bf16   b2_ref: (1, C) f32   o_ref: (tm, C) f32 (resident acc)
    h_idx = pl.program_id(1)

    @pl.when(h_idx == 0)
    def _():
        o_ref[...] = jnp.zeros_like(o_ref)

    # Per-tile bf16 cast (no whole-array cast pass outside the kernel).
    h = jnp.dot(x_ref[...].astype(jnp.bfloat16), w1_ref[...],
                preferred_element_type=jnp.float32)
    h = jnp.maximum(h + b1_ref[...], 0.0)                 # bias (per-chunk) + ReLU
    o_ref[...] += jnp.dot(h.astype(jnp.bfloat16), w2_ref[...],
                          preferred_element_type=jnp.float32)

    @pl.when(h_idx == pl.num_programs(1) - 1)
    def _():
        o_ref[...] += b2_ref[...]                          # b2 exactly once


def _ffwd_kernel_acc(x_ref, w1_ref, b1_ref, w2_ref, b2_ref, o_ref, acc_ref):
    # Same as above but with an f32 VMEM scratch accumulator for non-f32 outputs.
    h_idx = pl.program_id(1)

    @pl.when(h_idx == 0)
    def _():
        acc_ref[...] = jnp.zeros_like(acc_ref)

    h = jnp.dot(x_ref[...].astype(jnp.bfloat16), w1_ref[...],
                preferred_element_type=jnp.float32)
    h = jnp.maximum(h + b1_ref[...], 0.0)
    acc_ref[...] += jnp.dot(h.astype(jnp.bfloat16), w2_ref[...],
                            preferred_element_type=jnp.float32)

    @pl.when(h_idx == pl.num_programs(1) - 1)
    def _():
        o_ref[...] = (acc_ref[...] + b2_ref[...]).astype(o_ref.dtype)


# ----------------------------- tiling ---------------------------------------


def _tile_vmem_bytes(row_tile, hid_tile, C, x_itemsize, out_itemsize, use_acc):
    """Approximate VMEM footprint of the double-buffered tile set."""
    vmem = 0
    vmem += 2 * row_tile * C * x_itemsize        # x tile (x dtype), double-buffered
    vmem += 2 * C * hid_tile * 2                 # W1 chunk, bf16
    vmem += 2 * hid_tile * C * 2                 # W2 chunk, bf16
    vmem += 2 * 8 * _round_up(hid_tile, 128) * 4  # b1 (sublane-padded), tiny
    vmem += 2 * 8 * _round_up(C, 128) * 4         # b2, tiny
    vmem += 2 * row_tile * C * out_itemsize      # out tile
    if use_acc:
        vmem += row_tile * C * 4                 # f32 scratch accumulator
    return vmem


def _pick_tiles(M, C, H_pad, x_itemsize, out_itemsize, use_acc, budget):
    # Hidden-chunk candidates: divisors of H_pad that are multiples of 128
    # (largest first; full H preferred -> fewer accumulator passes / grid steps).
    hid_cands = []
    for c in (H_pad, 2048, 1024, 512, 256, 128):
        if c <= H_pad and H_pad % c == 0 and c not in hid_cands:
            hid_cands.append(c)

    # Row-tile candidates: maximize arithmetic intensity against the weights.
    m_cap = _round_up(M, 128)
    row_cands = [c for c in (1024, 768, 512, 384, 256, 128) if c <= m_cap]
    if not row_cands:
        row_cands = [max(16, _round_up(M, 16))]  # tiny-M fallback (bf16 sublane pack)

    row_tile, hid_tile = row_cands[-1], hid_cands[-1]
    for rc in row_cands:
        picked = False
        for hc in hid_cands:
            if _tile_vmem_bytes(rc, hc, C, x_itemsize, out_itemsize, use_acc) <= budget:
                row_tile, hid_tile = rc, hc
                picked = True
                break
        if picked:
            break
    return row_tile, hid_tile


# ----------------------------- wrapper --------------------------------------


def feedforward_pallas(x, w1, b1, w2, b2, *, tm=None, th=None):
    """x: (B, T, C).  w1: (C, H), b1: (H,), w2: (H, C), b2: (C,).  Returns (B, T, C).

    tm / th override the auto-picked row / hidden tiles (mainly for testing).
    Pass w1/w2 already in bf16 to keep the one-time cast off the hot path.
    """
    B, T, C = x.shape
    H = w1.shape[1]
    M = B * T
    out_dtype = x.dtype
    f32_out = jnp.dtype(out_dtype) == jnp.dtype(jnp.float32)
    x_itemsize = jnp.dtype(x.dtype).itemsize
    out_itemsize = jnp.dtype(out_dtype).itemsize

    # ---- per-chip VMEM budget ----
    try:
        phys_vmem = int(pltpu.get_tpu_info().vmem_capacity_bytes)
    except Exception:
        phys_vmem = 64 << 20                     # conservative (v7x per-TC)
    budget = int(phys_vmem * 0.75)

    # ---- pad H to a multiple of 128 (zero padding is a no-op through ReLU/W2) ----
    H_pad = _round_up(H, 128)

    row_tile, hid_tile = _pick_tiles(M, C, H_pad, x_itemsize, out_itemsize,
                                     not f32_out, budget)
    if tm is not None:
        row_tile = max(16, _round_up(int(tm), 16))
    if th is not None and H_pad % int(th) == 0 and int(th) % 128 == 0:
        hid_tile = int(th)

    m_pad = _round_up(M, row_tile)
    needed = _tile_vmem_bytes(row_tile, hid_tile, C, x_itemsize, out_itemsize,
                              not f32_out)
    vmem_limit = int(min(phys_vmem * 0.92, max(needed + (16 << 20), 64 << 20)))
    vmem_limit = max(vmem_limit, needed + (2 << 20))

    # ---- input plumbing (no whole-array bf16 cast of x; pad only when needed) ----
    x2 = x.reshape(M, C)
    if m_pad != M:
        x2 = jnp.pad(x2, ((0, m_pad - M), (0, 0)))
    w1b = w1 if w1.dtype == jnp.bfloat16 else w1.astype(jnp.bfloat16)
    w2b = w2 if w2.dtype == jnp.bfloat16 else w2.astype(jnp.bfloat16)
    b1f = b1.astype(jnp.float32)
    if H_pad != H:
        w1b = jnp.pad(w1b, ((0, 0), (0, H_pad - H)))
        w2b = jnp.pad(w2b, ((0, H_pad - H), (0, 0)))
        b1f = jnp.pad(b1f, ((0, H_pad - H),))
    b1_2 = b1f.reshape(1, H_pad)
    b2_2 = b2.astype(jnp.float32).reshape(1, C)

    grid = (m_pad // row_tile, H_pad // hid_tile)
    n_row_tiles = grid[0]

    # Two matmuls, 2*M*C*H flops each; weights re-streamed once per row tile.
    flops = 4 * m_pad * C * H_pad
    bytes_accessed = (
        x2.size * x_itemsize
        + n_row_tiles * (w1b.size * 2 + w2b.size * 2 + b1_2.size * 4 + b2_2.size * 4)
        + m_pad * C * out_itemsize)

    in_specs = [
        pl.BlockSpec((row_tile, C), lambda i, h: (i, 0)),   # x rows
        pl.BlockSpec((C, hid_tile), lambda i, h: (0, h)),   # W1 chunk
        pl.BlockSpec((1, hid_tile), lambda i, h: (0, h)),   # b1 chunk
        pl.BlockSpec((hid_tile, C), lambda i, h: (h, 0)),   # W2 chunk
        pl.BlockSpec((1, C), lambda i, h: (0, 0)),          # b2 (epilogue)
    ]
    out_spec = pl.BlockSpec((row_tile, C), lambda i, h: (i, 0))

    if f32_out:
        kernel = _ffwd_kernel_f32out
        scratch_shapes = []
    else:
        kernel = _ffwd_kernel_acc
        scratch_shapes = [pltpu.VMEM((row_tile, C), jnp.float32)]

    out = pl.pallas_call(
        kernel,
        out_shape=jax.ShapeDtypeStruct((m_pad, C), out_dtype),
        grid_spec=pltpu.PrefetchScalarGridSpec(
            num_scalar_prefetch=0,
            grid=grid,
            in_specs=in_specs,
            out_specs=out_spec,
            scratch_shapes=scratch_shapes,
        ),
        compiler_params=pltpu.CompilerParams(
            dimension_semantics=("parallel", "arbitrary"),
            vmem_limit_bytes=vmem_limit),
        cost_estimate=pl.CostEstimate(flops=flops, transcendentals=0,
                                      bytes_accessed=bytes_accessed),
    )(x2, w1b, b1_2, w2b, b2_2)

    return out[:M].reshape(B, T, C)


# ----------------------------- demo / check ---------------------------------


if __name__ == "__main__":
    # Small but lane-dense shapes (C multiple of 128): M = 512 rows, H = 512.
    B, T, n_embd = 2, 256, 128
    hidden = 4 * n_embd                           # 512

    key = jax.random.PRNGKey(0)
    kx, kw1, kb1, kw2, kb2 = jax.random.split(key, 5)

    x = jax.random.normal(kx, (B, T, n_embd), dtype=jnp.float32)
    bound1 = 1.0 / (n_embd ** 0.5)
    w1 = jax.random.uniform(kw1, (n_embd, hidden), jnp.float32, -bound1, bound1)
    b1 = jax.random.uniform(kb1, (hidden,), jnp.float32, -bound1, bound1)
    bound2 = 1.0 / (hidden ** 0.5)
    w2 = jax.random.uniform(kw2, (hidden, n_embd), jnp.float32, -bound2, bound2)
    b2 = jax.random.uniform(kb2, (n_embd,), jnp.float32, -bound2, bound2)

    # Cast weights to bf16 once, outside the hot path.
    w1b = w1.astype(jnp.bfloat16)
    w2b = w2.astype(jnp.bfloat16)

    # Reference with matching bf16 matmul inputs / f32 accumulation.
    x2 = x.reshape(-1, n_embd).astype(jnp.bfloat16)
    h_ref = jnp.maximum(
        jnp.dot(x2, w1b, preferred_element_type=jnp.float32) + b1, 0.0)
    ref = (jnp.dot(h_ref.astype(jnp.bfloat16), w2b,
                   preferred_element_type=jnp.float32) + b2)
    ref = ref.reshape(B, T, n_embd).astype(x.dtype)

    # 1) Auto-picked tiles (single big tile on these shapes).
    y = feedforward_pallas(x, w1b, b1, w2b, b2)
    jax.block_until_ready(y)
    assert jnp.allclose(y, ref, atol=2e-2, rtol=2e-2), (
        float(jnp.max(jnp.abs(y - ref))))

    # 2) Forced small tiles to exercise the multi-step grid / accumulation path.
    y2 = feedforward_pallas(x, w1b, b1, w2b, b2, tm=128, th=128)
    jax.block_until_ready(y2)
    assert jnp.allclose(y2, ref, atol=2e-2, rtol=2e-2), (
        float(jnp.max(jnp.abs(y2 - ref))))

    print("KERNEL_OK")
</pallas_src>

<mosaic_0001>
module attributes {stable_mosaic.version = 11 : i64} {
  func.func @_ffwd_kernel_f32out(%arg0: i32, %arg1: i32, %arg2: memref<512x128xf32, #tpu.memory_space<vmem>>, %arg3: memref<128x512xbf16, #tpu.memory_space<vmem>>, %arg4: memref<1x512xf32, #tpu.memory_space<vmem>>, %arg5: memref<512x128xbf16, #tpu.memory_space<vmem>>, %arg6: memref<1x128xf32, #tpu.memory_space<vmem>>, %arg7: memref<512x128xf32, #tpu.memory_space<vmem>>) attributes {dimension_semantics = [#tpu.dimension_semantics<parallel>, #tpu.dimension_semantics<arbitrary>], iteration_bounds = array<i64: 1, 1>, scalar_prefetch = 0 : i64, scratch_operands = 0 : i64, tpu.core_type = #tpu.core_type<tc>, window_params = [{transform_indices = @transform_0, window_bounds = array<i64: 512, 128>}, {transform_indices = @transform_1, window_bounds = array<i64: 128, 512>}, {transform_indices = @transform_2, window_bounds = array<i64: 1, 512>}, {transform_indices = @transform_3, window_bounds = array<i64: 512, 128>}, {pipeline_mode = #tpu.pipeline_mode<synchronous>, transform_indices = @transform_4, window_bounds = array<i64: 1, 128>}, {transform_indices = @transform_5, window_bounds = array<i64: 512, 128>}]} {
    %c0_i32 = arith.constant 0 : i32
    %0 = arith.cmpi eq, %arg1, %c0_i32 : i32
    %1 = arith.extui %0 : i1 to i32
    %c0_i32_0 = arith.constant 0 : i32
    %2 = arith.cmpi ne, %1, %c0_i32_0 : i32
    scf.if %2 {
      %cst_16 = arith.constant 0.000000e+00 : f32
      %21 = vector.broadcast %cst_16 : f32 to vector<512x128xf32>
      %c0_17 = arith.constant 0 : index
      %c0_18 = arith.constant 0 : index
      %22 = vector.load %arg7[%c0_17, %c0_18] : memref<512x128xf32, #tpu.memory_space<vmem>>, vector<512x128xf32>
      tpu.vector_store %arg7[%c0_17, %c0_18], %21 {strides = array<i32>} : memref<512x128xf32, #tpu.memory_space<vmem>>, vector<512x128xf32>,
    } else {
    }
    %c0 = arith.constant 0 : index
    %c0_1 = arith.constant 0 : index
    %3 = vector.load %arg2[%c0, %c0_1] : memref<512x128xf32, #tpu.memory_space<vmem>>, vector<512x128xf32>
    %4 = arith.truncf %3 : vector<512x128xf32> to vector<512x128xbf16>
    %c0_2 = arith.constant 0 : index
    %c0_3 = arith.constant 0 : index
    %5 = vector.load %arg3[%c0_2, %c0_3] : memref<128x512xbf16, #tpu.memory_space<vmem>>, vector<128x512xbf16>
    %cst = arith.constant dense<0.000000e+00> : vector<512x512xf32>
    %6 = tpu.matmul %4, %5, %cst {dimension_numbers = #tpu.dot_dimension_numbers<[1], [0], [0], [1], [0, 0, 1, 1], [], []>} : vector<512x128xbf16>, vector<128x512xbf16>, vector<512x512xf32> -> vector<512x512xf32>
    %c0_4 = arith.constant 0 : index
    %c0_5 = arith.constant 0 : index
    %7 = vector.load %arg4[%c0_4, %c0_5] : memref<1x512xf32, #tpu.memory_space<vmem>>, vector<1x512xf32>
    %8 = vector.broadcast %7 : vector<1x512xf32> to vector<512x512xf32>
    %9 = arith.addf %6, %8 : vector<512x512xf32>
    %cst_6 = arith.constant 0.000000e+00 : f32
    %10 = vector.broadcast %cst_6 : f32 to vector<512x512xf32>
    %11 = arith.maximumf %9, %10 : vector<512x512xf32>
    %c0_7 = arith.constant 0 : index
    %c0_8 = arith.constant 0 : index
    %12 = vector.load %arg7[%c0_7, %c0_8] : memref<512x128xf32, #tpu.memory_space<vmem>>, vector<512x128xf32>
    %13 = arith.truncf %11 : vector<512x512xf32> to vector<512x512xbf16>
    %c0_9 = arith.constant 0 : index
    %c0_10 = arith.constant 0 : index
    %14 = vector.load %arg5[%c0_9, %c0_10] : memref<512x128xbf16, #tpu.memory_space<vmem>>, vector<512x128xbf16>
    %cst_11 = arith.constant dense<0.000000e+00> : vector<512x128xf32>
    %15 = tpu.matmul %13, %14, %cst_11 {dimension_numbers = #tpu.dot_dimension_numbers<[1], [0], [0], [1], [0, 0, 1, 1], [], []>} : vector<512x512xbf16>, vector<512x128xbf16>, vector<512x128xf32> -> vector<512x128xf32>
    %16 = arith.addf %12, %15 : vector<512x128xf32>
    %c0_12 = arith.constant 0 : index
    %c0_13 = arith.constant 0 : index
    %17 = vector.load %arg7[%c0_12, %c0_13] : memref<512x128xf32, #tpu.memory_space<vmem>>, vector<512x128xf32>
    tpu.vector_store %arg7[%c0_12, %c0_13], %16 {strides = array<i32>} : memref<512x128xf32, #tpu.memory_space<vmem>>, vector<512x128xf32>,
    %c0_i32_14 = arith.constant 0 : i32
    %18 = arith.cmpi eq, %arg1, %c0_i32_14 : i32
    %19 = arith.extui %18 : i1 to i32
    %c0_i32_15 = arith.constant 0 : i32
    %20 = arith.cmpi ne, %19, %c0_i32_15 : i32
    scf.if %20 {
      %c0_16 = arith.constant 0 : index
      %c0_17 = arith.constant 0 : index
      %21 = vector.load %arg7[%c0_16, %c0_17] : memref<512x128xf32, #tpu.memory_space<vmem>>, vector<512x128xf32>
      %c0_18 = arith.constant 0 : index
      %c0_19 = arith.constant 0 : index
      %22 = vector.load %arg6[%c0_18, %c0_19] : memref<1x128xf32, #tpu.memory_space<vmem>>, vector<1x128xf32>
      %23 = vector.broadcast %22 : vector<1x128xf32> to vector<512x128xf32>
      %24 = arith.addf %21, %23 : vector<512x128xf32>
      %c0_20 = arith.constant 0 : index
      %c0_21 = arith.constant 0 : index
      %25 = vector.load %arg7[%c0_20, %c0_21] : memref<512x128xf32, #tpu.memory_space<vmem>>, vector<512x128xf32>
      tpu.vector_store %arg7[%c0_20, %c0_21], %24 {strides = array<i32>} : memref<512x128xf32, #tpu.memory_space<vmem>>, vector<512x128xf32>,
    } else {
    }
    return
  }
  func.func @transform_0(%arg0: i32, %arg1: i32) -> (i32, i32) {
    %c0_i32 = arith.constant 0 : i32
    %c0_i32_0 = arith.constant 0 : i32
    return %arg0, %c0_i32 : i32, i32
  }
  func.func @transform_1(%arg0: i32, %arg1: i32) -> (i32, i32) {
    %c0_i32 = arith.constant 0 : i32
    %c0_i32_0 = arith.constant 0 : i32
    return %c0_i32, %arg1 : i32, i32
  }
  func.func @transform_2(%arg0: i32, %arg1: i32) -> (i32, i32) {
    %c0_i32 = arith.constant 0 : i32
    %c0_i32_0 = arith.constant 0 : i32
    return %c0_i32, %arg1 : i32, i32
  }
  func.func @transform_3(%arg0: i32, %arg1: i32) -> (i32, i32) {
    %c0_i32 = arith.constant 0 : i32
    %c0_i32_0 = arith.constant 0 : i32
    return %arg1, %c0_i32 : i32, i32
  }
  func.func @transform_4(%arg0: i32, %arg1: i32) -> (i32, i32) {
    %c0_i32 = arith.constant 0 : i32
    %c0_i32_0 = arith.constant 0 : i32
    %c0_i32_1 = arith.constant 0 : i32
    return %c0_i32, %c0_i32_0 : i32, i32
  }
  func.func @transform_5(%arg0: i32, %arg1: i32) -> (i32, i32) {
    %c0_i32 = arith.constant 0 : i32
    %c0_i32_0 = arith.constant 0 : i32
    return %arg0, %c0_i32 : i32, i32
  }
}

</mosaic_0001>

<bundles_post_ra>
// kernel: tpu_custom_call.1
= control target key start
LH: loop header
LB: loop body
LE: loop exit
PB: predicated region body
PF: predicated region fallthrough
CT: control target
= control target key end

     0   :  { %10 = vsyncpa [#allocation3], 0  ;;  %s3941_s0 = inlined_call_operand.hbm [shape: f32[512,128], index: 0, kind: input, shape index: {}]   ;;  %s3942_s1 = inlined_call_operand.hbm [shape: bf16[128,512], index: 1, kind: input, shape index: {}]   ;;  %s3943_s2 = inlined_call_operand.vmem [shape: f32[1,512], index: 2, kind: input, shape index: {}]   ;;  %s3944_s3 = inlined_call_operand.hbm [shape: bf16[512,128], index: 3, kind: input, shape index: {}]   ;;  %s3945_s4 = inlined_call_operand.vmem [shape: f32[1,128], index: 4, kind: input, shape index: {}]   ;;  %s3946_s5 = inlined_call_operand.hbm [shape: f32[512,128], index: 5, kind: output, shape index: {}]  }
   0x1   :  { %11 = vsyncpa [#allocation6], 0 }
   0x2   :  { %12 = vsyncpa [#allocation4], 0  ;;  %s3029_s18 = smov [#allocation5]   ;;  %s2935_s22 = scalar_lea.hbm %s3942_s1, 4096 }
   0x3   :  { %s30_s19 = sshll.u32 %s3029_s18, 4  ;;  %p2936_p0 = scmp.ne.s32.totalorder %s3942_s1, %s2935_s22  ;;  %s31_s19 = int_to_ptr.vmem [resolvable:$true] %s30_s19 }
   0x4   :  { %p2939_p1 = scmp.lt.u32.totalorder %s2935_s22, %s3942_s1 }
   0x6   :  { %p2941_p2 = pnand %p2939_p1, %p2936_p0 }
   0x8   :  { %2944 = shalt.err (!%p2941_p2)
}
   0x9   :  { %s2945_s27 = scalar_lea.vmem %s31_s19, 4096  ;;  %p2950_p4 = scmp.lt.s32.totalorder %s31_s19, %s31_s19 }
   0xa   :  { %p2946_p3 = scmp.ne.s32.totalorder %s31_s19, %s2945_s27  ;;  %p2951_p5 = scmp.lt.s32.totalorder %s2945_s27, %s2945_s27 }
   0xc   :  { %p2952_p6 = por %p2951_p5, %p2950_p4 }
   0xe   :  { %p2953_p7 = pnand %p2952_p6, %p2946_p3 }
  0x10   :  { %2956 = shalt.err (!%p2953_p7)
}
  0x11   :  { %s3030_s28 = smov 256   ;;  %s3031_s29 = smov 16  }
  0x12   :  { %36 = dma.hbm_to_vmem [thread:$0]  %s3942_s1, 4096, %s31_s19, [#allocation6], %s3030_s28, %s3030_s28, %s3031_s29  }
  0x13   :  { %s3032_s7 = smov [#allocation2]   ;;  %s2957_s11 = scalar_lea.hbm %s3941_s0, 8192 }
  0x14   :  { %s18_s8 = sshll.u32 %s3032_s7, 4  ;;  %p2958_p8 = scmp.ne.s32.totalorder %s3941_s0, %s2957_s11  ;;  %s19_s8 = int_to_ptr.vmem [resolvable:$true] %s18_s8 }
  0x15   :  { %p2961_p9 = scmp.lt.u32.totalorder %s2957_s11, %s3941_s0 }
  0x17   :  { %p2963_p10 = pnand %p2961_p9, %p2958_p8 }
  0x19   :  { %2966 = shalt.err (!%p2963_p10)
}
  0x1a   :  { %s2967_s16 = scalar_lea.vmem %s19_s8, 8192  ;;  %p2972_p12 = scmp.lt.s32.totalorder %s19_s8, %s19_s8 }
  0x1b   :  { %p2968_p11 = scmp.ne.s32.totalorder %s19_s8, %s2967_s16  ;;  %p2973_p13 = scmp.lt.s32.totalorder %s2967_s16, %s2967_s16 }
  0x1d   :  { %p2974_p0 = por %p2973_p13, %p2972_p12 }
  0x1f   :  { %p2975_p1 = pnand %p2974_p0, %p2968_p11 }
  0x21   :  { %2978 = shalt.err (!%p2975_p1)
}
  0x22   :  { %s3033_s1 = smov 128   ;;  %s3034_s17 = smov 8  }
  0x23   :  { %24 = dma.hbm_to_vmem [thread:$0]  %s3941_s0, 8192, %s19_s8, [#allocation3], %s3033_s1, %s3033_s1, %s3034_s17  }
  0x24   :  { %s3035_s20 = smov [#allocation7]   ;;  %s2979_s24 = scalar_lea.hbm %s3944_s3, 4096 }
  0x25   :  { %s44_s21 = sshll.u32 %s3035_s20, 4  ;;  %p2980_p2 = scmp.ne.s32.totalorder %s3944_s3, %s2979_s24  ;;  %s45_s21 = int_to_ptr.vmem [resolvable:$true] %s44_s21 }
  0x26   :  { %p2983_p3 = scmp.lt.u32.totalorder %s2979_s24, %s3944_s3 }
  0x28   :  { %p2985_p4 = pnand %p2983_p3, %p2980_p2 }
  0x2a   :  { %2988 = shalt.err (!%p2985_p4)
}
  0x2b   :  { %s2989_s29 = scalar_lea.vmem %s45_s21, 4096  ;;  %p2994_p6 = scmp.lt.s32.totalorder %s45_s21, %s45_s21 }
  0x2c   :  { %p2990_p5 = scmp.ne.s32.totalorder %s45_s21, %s2989_s29  ;;  %p2995_p7 = scmp.lt.s32.totalorder %s2989_s29, %s2989_s29 }
  0x2e   :  { %p2996_p8 = por %p2995_p7, %p2994_p6 }
  0x30   :  { %p2997_p9 = pnand %p2996_p8, %p2990_p5 }
  0x32   :  { %3000 = shalt.err (!%p2997_p9)
}
  0x33   :  { %s3036_s0 = smov 64   ;;  %s3037_s30 = smov 4  }
  0x34   :  { %50 = dma.hbm_to_vmem [thread:$0]  %s3944_s3, 4096, %s45_s21, [#allocation6], %s3036_s0, %s3036_s0, %s3037_s30  }
  0x35   :  { %3023 = dma.done.wait [#allocation3], 8192  }
  0x36   :  { %3024 = vsyncadd [#allocation3], 4294959104 }
  0x37   :  { %3025 = dma.done.wait [#allocation6], 8192  }
  0x38   :  { %3026 = vsyncadd [#allocation6], 4294959104  ;;  %v3038_v0 = vmov 0   ;;  %v2854_v1 = vld [vmem:[#allocation5 + $0x4] ss:$16 sps:$4 sm:$0xff]   ;;  %v132_v34 = vld [vmem:[#allocation2 + $0x8] sm:$0xff] }
  0x39   :  { %473 = vmatprep.mubr.bf16.mxu0 %v3038_v0  ;;  %826 = vmatprep.mubr.bf16.mxu1 %v3038_v0  ;;  %v2856_v2 = vld [vmem:[#allocation5 + $0xc] ss:$16 sps:$4 sm:$0xff]   ;;  %v2858_v3 = vld [vmem:[#allocation5] ss:$16 sps:$4 sm:$0xff]   ;;  %v2859_v4 = vld [vmem:[#allocation5 + $0x8] ss:$16 sps:$4 sm:$0xff]  }
  0x3a   :  { %441 = vmatprep.subr.bf16.mxu0 %v2854_v1  ;;  %794 = vmatprep.subr.bf16.mxu1 %v2856_v2  ;;  %v2860_v5 = vld [vmem:[#allocation5 + $0x24] ss:$16 sps:$4 sm:$0xff]   ;;  %v2862_v6 = vld [vmem:[#allocation5 + $0x2c] ss:$16 sps:$4 sm:$0xff]   ;;  %v2864_v7 = vld [vmem:[#allocation5 + $0x20] ss:$16 sps:$4 sm:$0xff]  }
  0x3b   :  { %442 = vmatpush1.bf16.msra.mxu0 %v2858_v3  ;;  %795 = vmatpush1.bf16.msra.mxu1 %v2859_v4  ;;  %v2865_v8 = vld [vmem:[#allocation5 + $0x28] ss:$16 sps:$4 sm:$0xff]   ;;  %v2866_v9 = vld [vmem:[#allocation5 + $0x44] ss:$16 sps:$4 sm:$0xff]   ;;  %v2868_v10 = vld [vmem:[#allocation5 + $0x4c] ss:$16 sps:$4 sm:$0xff]  }
  0x3c   :  { %443 = vmatprep.subr.bf16.mxu0 %v2860_v5  ;;  %796 = vmatprep.subr.bf16.mxu1 %v2862_v6  ;;  %v2870_v11 = vld [vmem:[#allocation5 + $0x40] ss:$16 sps:$4 sm:$0xff]   ;;  %v2871_v12 = vld [vmem:[#allocation5 + $0x48] ss:$16 sps:$4 sm:$0xff]   ;;  %v2872_v13 = vld [vmem:[#allocation5 + $0x64] ss:$16 sps:$4 sm:$0xff]  }
  0x3d   :  { %v2874_v14 = vld [vmem:[#allocation5 + $0x6c] ss:$16 sps:$4 sm:$0xff]   ;;  %v2876_v15 = vld [vmem:[#allocation5 + $0x60] ss:$16 sps:$4 sm:$0xff]   ;;  %v2877_v16 = vld [vmem:[#allocation5 + $0x68] ss:$16 sps:$4 sm:$0xff]  }
  0x3e   :  { %v2878_v17 = vld [vmem:[#allocation5 + $0x84] ss:$16 sps:$4 sm:$0xff]   ;;  %v2880_v18 = vld [vmem:[#allocation5 + $0x8c] ss:$16 sps:$4 sm:$0xff]   ;;  %v2882_v19 = vld [vmem:[#allocation5 + $0x80] ss:$16 sps:$4 sm:$0xff]  }
  0x3f   :  { %444 = vmatpush1.bf16.msra.mxu0 %v2864_v7  ;;  %797 = vmatpush1.bf16.msra.mxu1 %v2865_v8  ;;  %v2883_v20 = vld [vmem:[#allocation5 + $0x88] ss:$16 sps:$4 sm:$0xff]   ;;  %v2884_v21 = vld [vmem:[#allocation5 + $0xa4] ss:$16 sps:$4 sm:$0xff]   ;;  %v2886_v22 = vld [vmem:[#allocation5 + $0xac] ss:$16 sps:$4 sm:$0xff]  }
  0x40   :  { %445 = vmatprep.subr.bf16.mxu0 %v2866_v9  ;;  %798 = vmatprep.subr.bf16.mxu1 %v2868_v10  ;;  %v2888_v23 = vld [vmem:[#allocation5 + $0xa0] ss:$16 sps:$4 sm:$0xff]   ;;  %v2889_v24 = vld [vmem:[#allocation5 + $0xa8] ss:$16 sps:$4 sm:$0xff]   ;;  %v2890_v25 = vld [vmem:[#allocation5 + $0xc4] ss:$16 sps:$4 sm:$0xff]  }
  0x41   :  { %v2892_v26 = vld [vmem:[#allocation5 + $0xcc] ss:$16 sps:$4 sm:$0xff]   ;;  %v2894_v27 = vld [vmem:[#allocation5 + $0xc0] ss:$16 sps:$4 sm:$0xff]   ;;  %v2895_v28 = vld [vmem:[#allocation5 + $0xc8] ss:$16 sps:$4 sm:$0xff]  }
  0x42   :  { %v2896_v29 = vld [vmem:[#allocation5 + $0xe4] ss:$16 sps:$4 sm:$0xff]   ;;  %v2898_v30 = vld [vmem:[#allocation5 + $0xec] ss:$16 sps:$4 sm:$0xff]   ;;  %v2900_v31 = vld [vmem:[#allocation5 + $0xe0] ss:$16 sps:$4 sm:$0xff]  }
  0x43   :  { %446 = vmatpush1.bf16.msra.mxu0 %v2870_v11  ;;  %799 = vmatpush1.bf16.msra.mxu1 %v2871_v12  ;;  %v2901_v32 = vld [vmem:[#allocation5 + $0xe8] ss:$16 sps:$4 sm:$0xff]   ;;  %v131_v33 = vld [vmem:[#allocation2] sm:$0xff]  ;;  %v133_v38 = vld [vmem:[#allocation2 + $0x10] sm:$0xff]  ;;  %s3039_s10 = smov [#allocation8]  }
  0x44   :  { %447 = vmatprep.subr.bf16.mxu0 %v2872_v13  ;;  %800 = vmatprep.subr.bf16.mxu1 %v2874_v14  ;;  %v195_v35 = vpack.c.bf16 %v132_v34, %v131_v33  ;;  %v2902_v36 = vld [vmem:[#allocation7] sm:$0xff]   ;;  %v134_v39 = vld [vmem:[#allocation2 + $0x18] sm:$0xff]  ;;  %v2904_v40 = vld [vmem:[#allocation7 + $0x8] sm:$0xff]   ;;  %s2764_s11 = sshll.u32 %s3039_s10, 4  ;;  %s2765_s11 = int_to_ptr.vmem [resolvable:$true] %s2764_s11 }
  0x45   :  { %v2903_v37 = vld [vmem:[#allocation7 + $0x80] sm:$0xff]   ;;  %v2905_v41 = vld [vmem:[#allocation7 + $0x88] sm:$0xff]   ;;  %v196_v42 = vpack.c.bf16 %v134_v39, %v133_v38  ;;  %v2906_v43 = vld [vmem:[#allocation7 + $0x10] sm:$0xff]   ;;  %s3001_s14 = scalar_lea.vmem %s2765_s11, 8192  ;;  %p3006_p11 = scmp.lt.s32.totalorder %s2765_s11, %s2765_s11 }
  0x46   :  { %v2907_v44 = vld [vmem:[#allocation7 + $0x90] sm:$0xff]   ;;  %v135_v45 = vld [vmem:[#allocation2 + $0x20] sm:$0xff]  ;;  %v136_v46 = vld [vmem:[#allocation2 + $0x28] sm:$0xff]  ;;  %p3002_p10 = scmp.ne.s32.totalorder %s2765_s11, %s3001_s14  ;;  %p3007_p12 = scmp.lt.s32.totalorder %s3001_s14, %s3001_s14 }
  0x47   :  { %448 = vmatpush1.bf16.msra.mxu0 %v2876_v15  ;;  %801 = vmatpush1.bf16.msra.mxu1 %v2877_v16  ;;  %v2908_v47 = vld [vmem:[#allocation7 + $0x18] sm:$0xff]   ;;  %v197_v49 = vpack.c.bf16 %v136_v46, %v135_v45  ;;  %v2910_v50 = vld [vmem:[#allocation7 + $0x20] sm:$0xff]   ;;  %v137_v52 = vld [vmem:[#allocation2 + $0x30] sm:$0xff] }
  0x48   :  { %449 = vmatprep.subr.bf16.mxu0 %v2878_v17  ;;  %802 = vmatprep.subr.bf16.mxu1 %v2880_v18  ;;  %v2909_v48 = vld [vmem:[#allocation7 + $0x98] sm:$0xff]   ;;  %v2911_v51 = vld [vmem:[#allocation7 + $0xa0] sm:$0xff]   ;;  %v2912_v54 = vld [vmem:[#allocation7 + $0x28] sm:$0xff]   ;;  %p3008_p13 = por %p3007_p12, %p3006_p11 }
  0x49   :  { %v138_v53 = vld [vmem:[#allocation2 + $0x38] sm:$0xff]  ;;  %v2913_v55 = vld [vmem:[#allocation7 + $0xa8] sm:$0xff]   ;;  %v2914_v57 = vld [vmem:[#allocation7 + $0x30] sm:$0xff]  }
  0x4a   :  { %v198_v56 = vpack.c.bf16 %v138_v53, %v137_v52  ;;  %v2915_v58 = vld [vmem:[#allocation7 + $0xb0] sm:$0xff]   ;;  %v139_v59 = vld [vmem:[#allocation2 + $0x40] sm:$0xff]  ;;  %v140_v60 = vld [vmem:[#allocation2 + $0x48] sm:$0xff]  ;;  %p3009_p0 = pnand %p3008_p13, %p3002_p10 }
  0x4b   :  { %450 = vmatpush1.bf16.msra.mxu0 %v2882_v19  ;;  %803 = vmatpush1.bf16.msra.mxu1 %v2883_v20  ;;  %v2916_v61 = vld [vmem:[#allocation7 + $0x38] sm:$0xff]   ;;  %v199_v63 = vpack.c.bf16 %v140_v60, %v139_v59  ;;  %v2918_v1 = vld [vmem:[#allocation7 + $0x40] sm:$0xff]   ;;  %v141_v3 = vld [vmem:[#allocation2 + $0x50] sm:$0xff] }
  0x4c   :  { %451 = vmatprep.subr.bf16.mxu0 %v2884_v21  ;;  %804 = vmatprep.subr.bf16.mxu1 %v2886_v22  ;;  %v2917_v62 = vld [vmem:[#allocation7 + $0xb8] sm:$0xff]   ;;  %v2919_v2 = vld [vmem:[#allocation7 + $0xc0] sm:$0xff]   ;;  %v2920_v5 = vld [vmem:[#allocation7 + $0x48] sm:$0xff]  }
  0x4d   :  { %v142_v4 = vld [vmem:[#allocation2 + $0x58] sm:$0xff]  ;;  %v2921_v6 = vld [vmem:[#allocation7 + $0xc8] sm:$0xff]   ;;  %v2922_v8 = vld [vmem:[#allocation7 + $0x50] sm:$0xff]  }
  0x4e   :  { %v200_v7 = vpack.c.bf16 %v142_v4, %v141_v3  ;;  %v2923_v9 = vld [vmem:[#allocation7 + $0xd0] sm:$0xff]   ;;  %v143_v10 = vld [vmem:[#allocation2 + $0x60] sm:$0xff]  ;;  %v144_v11 = vld [vmem:[#allocation2 + $0x68] sm:$0xff] }
  0x4f   :  { %452 = vmatpush1.bf16.msra.mxu0 %v2888_v23  ;;  %805 = vmatpush1.bf16.msra.mxu1 %v2889_v24  ;;  %v201_v12 = vpack.c.bf16 %v144_v11, %v143_v10  ;;  %v2924_v13 = vld [vmem:[#allocation7 + $0x58] sm:$0xff]   ;;  %v145_v15 = vld [vmem:[#allocation2 + $0x70] sm:$0xff]  ;;  %v147_v18 = vld [vmem:[#allocation2 + $0x80] sm:$0xff] }
  0x50   :  { %453 = vmatprep.subr.bf16.mxu0 %v2890_v25  ;;  %806 = vmatprep.subr.bf16.mxu1 %v2892_v26  ;;  %v2925_v14 = vld [vmem:[#allocation7 + $0xd8] sm:$0xff]   ;;  %v148_v19 = vld [vmem:[#allocation2 + $0x88] sm:$0xff]  ;;  %v2926_v21 = vld [vmem:[#allocation7 + $0x60] sm:$0xff]  }
  0x51   :  { %v146_v16 = vld [vmem:[#allocation2 + $0x78] sm:$0xff]  ;;  %v203_v20 = vpack.c.bf16 %v148_v19, %v147_v18  ;;  %v2927_v22 = vld [vmem:[#allocation7 + $0xe0] sm:$0xff]   ;;  %v149_v23 = vld [vmem:[#allocation2 + $0x90] sm:$0xff] }
  0x52   :  { %v202_v17 = vpack.c.bf16 %v146_v16, %v145_v15  ;;  %v150_v24 = vld [vmem:[#allocation2 + $0x98] sm:$0xff]  ;;  %v151_v26 = vld [vmem:[#allocation2 + $0xa0] sm:$0xff]  ;;  %v2930_v39 = vld [vmem:[#allocation7 + $0x70] sm:$0xff]  }
  0x53   :  { %454 = vmatpush1.bf16.msra.mxu0 %v2894_v27  ;;  %807 = vmatpush1.bf16.msra.mxu1 %v2895_v28  ;;  %v204_v25 = vpack.c.bf16 %v150_v24, %v149_v23  ;;  %v152_v27 = vld [vmem:[#allocation2 + $0xa8] sm:$0xff]  ;;  %v155_v34 = vld [vmem:[#allocation2 + $0xc0] sm:$0xff]  ;;  %v158_v38 = vld [vmem:[#allocation2 + $0xd8] sm:$0xff] }
  0x54   :  { %455 = vmatprep.subr.bf16.mxu0 %v2896_v29  ;;  %808 = vmatprep.subr.bf16.mxu1 %v2898_v30  ;;  %v205_v28 = vpack.c.bf16 %v152_v27, %v151_v26  ;;  %v2928_v29 = vld [vmem:[#allocation7 + $0x68] sm:$0xff]   ;;  %v161_v45 = vld [vmem:[#allocation2 + $0xf0] sm:$0xff]  ;;  %v162_v46 = vld [vmem:[#allocation2 + $0xf8] sm:$0xff] }
  0x55   :  { %v2929_v30 = vld [vmem:[#allocation7 + $0xe8] sm:$0xff]   ;;  %v165_v53 = vld [vmem:[#allocation2 + $0x110] sm:$0xff]  ;;  %v170_v60 = vld [vmem:[#allocation2 + $0x138] sm:$0xff] }
  0x56   :  { %v169_v59 = vld [vmem:[#allocation2 + $0x130] sm:$0xff]  ;;  %v174_v3 = vld [vmem:[#allocation2 + $0x158] sm:$0xff]  ;;  %v179_v11 = vld [vmem:[#allocation2 + $0x180] sm:$0xff] }
  0x57   :  { %456 = vmatpush1.bf16.msra.mxu0 %v2900_v31  ;;  %809 = vmatpush1.bf16.msra.mxu1 %v2901_v32  ;;  %v153_v31 = vld [vmem:[#allocation2 + $0xb0] sm:$0xff]  ;;  %v154_v32 = vld [vmem:[#allocation2 + $0xb8] sm:$0xff]  ;;  %v183_v19 = vld [vmem:[#allocation2 + $0x1a0] sm:$0xff] }
  0x58   :  { %1851 = vmatprep.subr.bf16.mxu0 %v3038_v0  ;;  %2140 = vmatprep.subr.bf16.mxu1 %v3038_v0  ;;  %v206_v33 = vpack.c.bf16 %v154_v32, %v153_v31  ;;  %v182_v15 = vld [vmem:[#allocation2 + $0x198] sm:$0xff]  ;;  %v259_v24 = vld [vmem:[%s3943_s2] sm:$0xf]  ;;  %v185_v31 = vld [vmem:[#allocation2 + $0x1b0] sm:$0xff] }
  0x59   :  { %v186_v32 = vld [vmem:[#allocation2 + $0x1b8] sm:$0xff] }
  0x5a   :  { %474 = vmatmul.mubr.bf16.vlgmr.msra.gmra.mrb[0].mxu0 %v195_v35  ;;  %827 = vmatmul.mubr.bf16.vlgmr.msra.gmra.mrb[0].mxu1 %v195_v35  ;;  %v156_v35 = vld [vmem:[#allocation2 + $0xc8] sm:$0xff] }
  0x5b   :  { %1852 = vmatpush1.bf16.msra.mxu0 %v2902_v36  ;;  %2141 = vmatpush1.bf16.msra.mxu1 %v2903_v37  ;;  %v207_v36 = vpack.c.bf16 %v156_v35, %v155_v34  ;;  %v157_v37 = vld [vmem:[#allocation2 + $0xd0] sm:$0xff] }
  0x5c   :  { %483 = vmatprep.mubr.bf16.mxu0 %v3038_v0  ;;  %836 = vmatprep.mubr.bf16.mxu1 %v3038_v0 }
  0x5d   :  { %1853 = vmatprep.subr.bf16.mxu0 %v3038_v0  ;;  %2142 = vmatprep.subr.bf16.mxu1 %v3038_v0 }
  0x5f   :  { %1854 = vmatpush1.bf16.msra.mxu0 %v2904_v40  ;;  %2143 = vmatpush1.bf16.msra.mxu1 %v2905_v41  ;;  %v2931_v40 = vld [vmem:[#allocation7 + $0xf0] sm:$0xff]   ;;  %v208_v41 = vpack.c.bf16 %v158_v38, %v157_v37 }
  0x60   :  { %1855 = vmatprep.subr.bf16.mxu0 %v3038_v0  ;;  %2144 = vmatprep.subr.bf16.mxu1 %v3038_v0 }
  0x62   :  { %484 = vmatmul.mubr.bf16.gmra.mrb[4].mxu0 %v196_v42  ;;  %837 = vmatmul.mubr.bf16.gmra.mrb[4].mxu1 %v196_v42  ;;  %v159_v42 = vld [vmem:[#allocation2 + $0xe0] sm:$0xff] }
  0x63   :  { %493 = vmatprep.mubr.bf16.mxu0 %v3038_v0  ;;  %846 = vmatprep.mubr.bf16.mxu1 %v3038_v0 }
  0x64   :  { %1856 = vmatpush1.bf16.msra.mxu0 %v2906_v43  ;;  %2145 = vmatpush1.bf16.msra.mxu1 %v2907_v44  ;;  %v160_v43 = vld [vmem:[#allocation2 + $0xe8] sm:$0xff] }
  0x65   :  { %1857 = vmatprep.subr.bf16.mxu0 %v3038_v0  ;;  %2146 = vmatprep.subr.bf16.mxu1 %v3038_v0  ;;  %v209_v44 = vpack.c.bf16 %v160_v43, %v159_v42 }
  0x68   :  { %1858 = vmatpush1.bf16.msra.mxu0 %v2908_v47  ;;  %2147 = vmatpush1.bf16.msra.mxu1 %v2909_v48  ;;  %v2932_v47 = vld [vmem:[#allocation7 + $0x78] sm:$0xff]  }
  0x69   :  { %1859 = vmatprep.subr.bf16.mxu0 %v3038_v0  ;;  %2148 = vmatprep.subr.bf16.mxu1 %v3038_v0  ;;  %v2933_v48 = vld [vmem:[#allocation7 + $0xf8] sm:$0xff]  }
  0x6a   :  { %494 = vmatmul.mubr.bf16.gmra.mrb[8].mxu0 %v197_v49  ;;  %847 = vmatmul.mubr.bf16.gmra.mrb[8].mxu1 %v197_v49  ;;  %v210_v49 = vpack.c.bf16 %v162_v46, %v161_v45 }
  0x6b   :  { %503 = vmatprep.mubr.bf16.mxu0 %v3038_v0  ;;  %856 = vmatprep.mubr.bf16.mxu1 %v3038_v0 }
  0x6c   :  { %1860 = vmatpush1.bf16.msra.mxu0 %v2910_v50  ;;  %2149 = vmatpush1.bf16.msra.mxu1 %v2911_v51  ;;  %v163_v50 = vld [vmem:[#allocation2 + $0x100] sm:$0xff]  ;;  %v164_v51 = vld [vmem:[#allocation2 + $0x108] sm:$0xff] }
  0x6d   :  { %1861 = vmatprep.subr.bf16.mxu0 %v3038_v0  ;;  %2150 = vmatprep.subr.bf16.mxu1 %v3038_v0  ;;  %v211_v52 = vpack.c.bf16 %v164_v51, %v163_v50 }
  0x70   :  { %1862 = vmatpush1.bf16.msra.mxu0 %v2912_v54  ;;  %2151 = vmatpush1.bf16.msra.mxu1 %v2913_v55  ;;  %v166_v54 = vld [vmem:[#allocation2 + $0x118] sm:$0xff] }
  0x71   :  { %1863 = vmatprep.subr.bf16.mxu0 %v3038_v0  ;;  %2152 = vmatprep.subr.bf16.mxu1 %v3038_v0  ;;  %v212_v55 = vpack.c.bf16 %v166_v54, %v165_v53 }
  0x72   :  { %504 = vmatmul.mubr.bf16.gmra.mrb[12].mxu0 %v198_v56  ;;  %857 = vmatmul.mubr.bf16.gmra.mrb[12].mxu1 %v198_v56  ;;  %v167_v56 = vld [vmem:[#allocation2 + $0x120] sm:$0xff] }
  0x73   :  { %513 = vmatprep.mubr.bf16.mxu0 %v3038_v0  ;;  %866 = vmatprep.mubr.bf16.mxu1 %v3038_v0 }
  0x74   :  { %1864 = vmatpush1.bf16.msra.mxu0 %v2914_v57  ;;  %2153 = vmatpush1.bf16.msra.mxu1 %v2915_v58  ;;  %v168_v57 = vld [vmem:[#allocation2 + $0x128] sm:$0xff] }
  0x75   :  { %1865 = vmatprep.subr.bf16.mxu0 %v3038_v0  ;;  %2154 = vmatprep.subr.bf16.mxu1 %v3038_v0  ;;  %v213_v58 = vpack.c.bf16 %v168_v57, %v167_v56 }
  0x78   :  { %1866 = vmatpush1.bf16.msra.mxu0 %v2916_v61  ;;  %2155 = vmatpush1.bf16.msra.mxu1 %v2917_v62  ;;  %v214_v61 = vpack.c.bf16 %v170_v60, %v169_v59  ;;  %v171_v62 = vld [vmem:[#allocation2 + $0x140] sm:$0xff]  ;;  %v188_v59 = vld [vmem:[#allocation2 + $0x1c8] sm:$0xff] }
  0x79   :  { %1867 = vmatprep.subr.bf16.mxu0 %v3038_v0  ;;  %2156 = vmatprep.subr.bf16.mxu1 %v3038_v0 }
  0x7a   :  { %514 = vmatmul.mubr.bf16.gmra.mrb[16].mxu0 %v199_v63  ;;  %867 = vmatmul.mubr.bf16.gmra.mrb[16].mxu1 %v199_v63  ;;  %v172_v63 = vld [vmem:[#allocation2 + $0x148] sm:$0xff] }
  0x7b   :  { %523 = vmatprep.mubr.bf16.mxu0 %v3038_v0  ;;  %876 = vmatprep.mubr.bf16.mxu1 %v3038_v0 }
  0x7c   :  { %1868 = vmatpush1.bf16.msra.mxu0 %v2918_v1  ;;  %2157 = vmatpush1.bf16.msra.mxu1 %v2919_v2  ;;  %v215_v1 = vpack.c.bf16 %v172_v63, %v171_v62  ;;  %v173_v2 = vld [vmem:[#allocation2 + $0x150] sm:$0xff] }
  0x7d   :  { %1869 = vmatprep.subr.bf16.mxu0 %v3038_v0  ;;  %2158 = vmatprep.subr.bf16.mxu1 %v3038_v0  ;;  %v216_v4 = vpack.c.bf16 %v174_v3, %v173_v2 }
  0x80   :  { %1870 = vmatpush1.bf16.msra.mxu0 %v2920_v5  ;;  %2159 = vmatpush1.bf16.msra.mxu1 %v2921_v6  ;;  %v175_v5 = vld [vmem:[#allocation2 + $0x160] sm:$0xff]  ;;  %v176_v6 = vld [vmem:[#allocation2 + $0x168] sm:$0xff] }
  0x81   :  { %1871 = vmatprep.subr.bf16.mxu0 %v3038_v0  ;;  %2160 = vmatprep.subr.bf16.mxu1 %v3038_v0 }
  0x82   :  { %524 = vmatmul.mubr.bf16.gmra.mrb[20].mxu0 %v200_v7  ;;  %877 = vmatmul.mubr.bf16.gmra.mrb[20].mxu1 %v200_v7  ;;  %v217_v7 = vpack.c.bf16 %v176_v6, %v175_v5 }
  0x83   :  { %533 = vmatprep.mubr.bf16.mxu0 %v3038_v0  ;;  %886 = vmatprep.mubr.bf16.mxu1 %v3038_v0 }
  0x84   :  { %1872 = vmatpush1.bf16.msra.mxu0 %v2922_v8  ;;  %2161 = vmatpush1.bf16.msra.mxu1 %v2923_v9  ;;  %v177_v8 = vld [vmem:[#allocation2 + $0x170] sm:$0xff]  ;;  %v178_v9 = vld [vmem:[#allocation2 + $0x178] sm:$0xff] }
  0x85   :  { %1873 = vmatprep.subr.bf16.mxu0 %v3038_v0  ;;  %2162 = vmatprep.subr.bf16.mxu1 %v3038_v0  ;;  %v218_v10 = vpack.c.bf16 %v178_v9, %v177_v8 }
  0x88   :  { %1874 = vmatpush1.bf16.msra.mxu0 %v2924_v13  ;;  %2163 = vmatpush1.bf16.msra.mxu1 %v2925_v14  ;;  %v181_v14 = vld [vmem:[#allocation2 + $0x190] sm:$0xff] }
  0x89   :  { %1875 = vmatprep.subr.bf16.mxu0 %v3038_v0  ;;  %2164 = vmatprep.subr.bf16.mxu1 %v3038_v0  ;;  %v220_v16 = vpack.c.bf16 %v182_v15, %v181_v14 }
  0x8a   :  { %534 = vmatmul.mubr.bf16.gmra.mrb[24].mxu0 %v201_v12  ;;  %887 = vmatmul.mubr.bf16.gmra.mrb[24].mxu1 %v201_v12  ;;  %v180_v12 = vld [vmem:[#allocation2 + $0x188] sm:$0xff] }
  0x8b   :  { %543 = vmatprep.mubr.bf16.mxu0 %v3038_v0  ;;  %896 = vmatprep.mubr.bf16.mxu1 %v3038_v0  ;;  %v219_v13 = vpack.c.bf16 %v180_v12, %v179_v11 }
  0x8c   :  { %1876 = vmatpush1.bf16.msra.mxu0 %v2926_v21  ;;  %2165 = vmatpush1.bf16.msra.mxu1 %v2927_v22 }
  0x8d   :  { %1877 = vmatprep.subr.bf16.mxu0 %v3038_v0  ;;  %2166 = vmatprep.subr.bf16.mxu1 %v3038_v0 }
  0x90   :  { %1878 = vmatpush1.bf16.msra.mxu0 %v2928_v29  ;;  %2167 = vmatpush1.bf16.msra.mxu1 %v2929_v30 }
  0x91   :  { %1879 = vmatprep.subr.bf16.mxu0 %v3038_v0  ;;  %2168 = vmatprep.subr.bf16.mxu1 %v3038_v0 }
  0x92   :  { %544 = vmatmul.mubr.bf16.gmra.mrb[28].mxu0 %v202_v17  ;;  %897 = vmatmul.mubr.bf16.gmra.mrb[28].mxu1 %v202_v17  ;;  %v261_v17 = vlaneseq }
  0x93   :  { %553 = vmatprep.mubr.bf16.mxu0 %v3038_v0  ;;  %906 = vmatprep.mubr.bf16.mxu1 %v3038_v0 }
  0x94   :  { %1880 = vmatpush1.bf16.msra.mxu0 %v2930_v39  ;;  %2169 = vmatpush1.bf16.msra.mxu1 %v2931_v40  ;;  %v262_v18 = vshrl.u32 %v261_v17, 7  ;;  %v222_v39 = vpack.c.bf16 %v186_v32, %v185_v31  ;;  %v190_v31 = vld [vmem:[#allocation2 + $0x1d8] sm:$0xff] }
  0x95   :  { %1881 = vmatprep.subr.bf16.mxu0 %v3038_v0  ;;  %2170 = vmatprep.subr.bf16.mxu1 %v3038_v0 }
  0x96   :  { %v263_v22 = vsub.s32 0, %v262_v18  ;;  %v271_v23 = vsub.s32 2, %v262_v18  ;;  %v275_v26 = vsub.s32 3, %v262_v18 }
  0x98   :  { %1882 = vmatpush1.bf16.msra.mxu0 %v2932_v47  ;;  %2171 = vmatpush1.bf16.msra.mxu1 %v2933_v48  ;;  %v3198_v27 = vrot.slane %v259_v24, %v263_v22  ;;  %v3204_v30 = vrot.slane %v259_v24, %v275_v26  ;;  %v189_v26 = vld [vmem:[#allocation2 + $0x1d0] sm:$0xff] }
  0x9a   :  { %554 = vmatmul.mubr.bf16.gmra.mrb[32].mxu0 %v203_v20  ;;  %907 = vmatmul.mubr.bf16.gmra.mrb[32].mxu1 %v203_v20  ;;  %v184_v20 = vld [vmem:[#allocation2 + $0x1a8] sm:$0xff] }
  0x9b   :  { %563 = vmatprep.mubr.bf16.mxu0 %v3038_v0  ;;  %916 = vmatprep.mubr.bf16.mxu1 %v3038_v0  ;;  %v221_v21 = vpack.c.bf16 %v184_v20, %v183_v19 }
  0xa2   :  { %564 = vmatmul.mubr.bf16.gmra.mrb[36].mxu0 %v204_v25  ;;  %917 = vmatmul.mubr.bf16.gmra.mrb[36].mxu1 %v204_v25  ;;  %v267_v25 = vsub.s32 1, %v262_v18 }
  0xa3   :  { %573 = vmatprep.mubr.bf16.mxu0 %v3038_v0  ;;  %926 = vmatprep.mubr.bf16.mxu1 %v3038_v0 }
  0xa4   :  { %v3202_v29 = vrot.slane %v259_v24, %v267_v25 }
  0xaa   :  { %574 = vmatmul.mubr.bf16.gmra.mrb[40].mxu0 %v205_v28  ;;  %927 = vmatmul.mubr.bf16.gmra.mrb[40].mxu1 %v205_v28  ;;  %v3200_v28 = vrot.slane %v259_v24, %v271_v23 }
  0xab   :  { %583 = vmatprep.mubr.bf16.mxu0 %v3038_v0  ;;  %936 = vmatprep.mubr.bf16.mxu1 %v3038_v0 }
  0xb2   :  { %584 = vmatmul.mubr.bf16.gmra.mrb[44].mxu0 %v206_v33  ;;  %937 = vmatmul.mubr.bf16.gmra.mrb[44].mxu1 %v206_v33 }
  0xb3   :  { %593 = vmatprep.mubr.bf16.mxu0 %v3038_v0  ;;  %946 = vmatprep.mubr.bf16.mxu1 %v3038_v0 }
  0xba   :  { %594 = vmatmul.mubr.bf16.gmra.mrb[48].mxu0 %v207_v36  ;;  %947 = vmatmul.mubr.bf16.gmra.mrb[48].mxu1 %v207_v36 }
  0xbb   :  { %603 = vmatprep.mubr.bf16.mxu0 %v3038_v0  ;;  %956 = vmatprep.mubr.bf16.mxu1 %v3038_v0 }
  0xc2   :  { %604 = vmatmul.mubr.bf16.gmra.mrb[52].mxu0 %v208_v41  ;;  %957 = vmatmul.mubr.bf16.gmra.mrb[52].mxu1 %v208_v41 }
  0xc3   :  { %613 = vmatprep.mubr.bf16.mxu0 %v3038_v0  ;;  %966 = vmatprep.mubr.bf16.mxu1 %v3038_v0 }
  0xca   :  { %614 = vmatmul.mubr.bf16.gmra.mrb[56].mxu0 %v209_v44  ;;  %967 = vmatmul.mubr.bf16.gmra.mrb[56].mxu1 %v209_v44 }
  0xcb   :  { %623 = vmatprep.mubr.bf16.mxu0 %v3038_v0  ;;  %976 = vmatprep.mubr.bf16.mxu1 %v3038_v0 }
  0xd2   :  { %624 = vmatmul.mubr.bf16.gmra.mrb[60].mxu0 %v210_v49  ;;  %977 = vmatmul.mubr.bf16.gmra.mrb[60].mxu1 %v210_v49 }
  0xd3   :  { %633 = vmatprep.mubr.bf16.mxu0 %v3038_v0  ;;  %986 = vmatprep.mubr.bf16.mxu1 %v3038_v0 }
  0xda   :  { %634 = vmatmul.mubr.bf16.gmra.mrb[64].mxu0 %v211_v52  ;;  %987 = vmatmul.mubr.bf16.gmra.mrb[64].mxu1 %v211_v52 }
  0xdb   :  { %643 = vmatprep.mubr.bf16.mxu0 %v3038_v0  ;;  %996 = vmatprep.mubr.bf16.mxu1 %v3038_v0 }
  0xe2   :  { %644 = vmatmul.mubr.bf16.gmra.mrb[68].mxu0 %v212_v55  ;;  %997 = vmatmul.mubr.bf16.gmra.mrb[68].mxu1 %v212_v55 }
  0xe3   :  { %653 = vmatprep.mubr.bf16.mxu0 %v3038_v0  ;;  %1006 = vmatprep.mubr.bf16.mxu1 %v3038_v0 }
  0xea   :  { %654 = vmatmul.mubr.bf16.gmra.mrb[72].mxu0 %v213_v58  ;;  %1007 = vmatmul.mubr.bf16.gmra.mrb[72].mxu1 %v213_v58  ;;  %v187_v58 = vld [vmem:[#allocation2 + $0x1c0] sm:$0xff] }
  0xeb   :  { %663 = vmatprep.mubr.bf16.mxu0 %v3038_v0  ;;  %1016 = vmatprep.mubr.bf16.mxu1 %v3038_v0 }
  0xf2   :  { %664 = vmatmul.mubr.bf16.gmra.mrb[76].mxu0 %v214_v61  ;;  %1017 = vmatmul.mubr.bf16.gmra.mrb[76].mxu1 %v214_v61 }
  0xf3   :  { %673 = vmatprep.mubr.bf16.mxu0 %v3038_v0  ;;  %1026 = vmatprep.mubr.bf16.mxu1 %v3038_v0 }
  0xfa   :  { %674 = vmatmul.mubr.bf16.gmra.mrb[80].mxu0 %v215_v1  ;;  %1027 = vmatmul.mubr.bf16.gmra.mrb[80].mxu1 %v215_v1 }
  0xfb   :  { %683 = vmatprep.mubr.bf16.mxu0 %v3038_v0  ;;  %1036 = vmatprep.mubr.bf16.mxu1 %v3038_v0 }
 0x102   :  { %684 = vmatmul.mubr.bf16.gmra.mrb[84].mxu0 %v216_v4  ;;  %1037 = vmatmul.mubr.bf16.gmra.mrb[84].mxu1 %v216_v4 }
 0x103   :  { %693 = vmatprep.mubr.bf16.mxu0 %v3038_v0  ;;  %1046 = vmatprep.mubr.bf16.mxu1 %v3038_v0 }
 0x10a   :  { %694 = vmatmul.mubr.bf16.gmra.mrb[88].mxu0 %v217_v7  ;;  %1047 = vmatmul.mubr.bf16.gmra.mrb[88].mxu1 %v217_v7  ;;  %v223_v7 = vpack.c.bf16 %v188_v59, %v187_v58 }
 0x10b   :  { %703 = vmatprep.mubr.bf16.mxu0 %v3038_v0  ;;  %1056 = vmatprep.mubr.bf16.mxu1 %v3038_v0 }
 0x112   :  { %704 = vmatmul.mubr.bf16.gmra.mrb[92].mxu0 %v218_v10  ;;  %1057 = vmatmul.mubr.bf16.gmra.mrb[92].mxu1 %v218_v10 }
 0x113   :  { %713 = vmatprep.mubr.bf16.mxu0 %v3038_v0  ;;  %1066 = vmatprep.mubr.bf16.mxu1 %v3038_v0 }
 0x11a   :  { %714 = vmatmul.mubr.bf16.gmra.mrb[96].mxu0 %v219_v13  ;;  %1067 = vmatmul.mubr.bf16.gmra.mrb[96].mxu1 %v219_v13 }
 0x11b   :  { %723 = vmatprep.mubr.bf16.mxu0 %v3038_v0  ;;  %1076 = vmatprep.mubr.bf16.mxu1 %v3038_v0 }
 0x122   :  { %724 = vmatmul.mubr.bf16.gmra.mrb[100].mxu0 %v220_v16  ;;  %1077 = vmatmul.mubr.bf16.gmra.mrb[100].mxu1 %v220_v16 }
 0x123   :  { %733 = vmatprep.mubr.bf16.mxu0 %v3038_v0  ;;  %1086 = vmatprep.mubr.bf16.mxu1 %v3038_v0 }
 0x12a   :  { %734 = vmatmul.mubr.bf16.gmra.mrb[104].mxu0 %v221_v21  ;;  %1087 = vmatmul.mubr.bf16.gmra.mrb[104].mxu1 %v221_v21 }
 0x12b   :  { %743 = vmatprep.mubr.bf16.mxu0 %v3038_v0  ;;  %1096 = vmatprep.mubr.bf16.mxu1 %v3038_v0 }
 0x12d   :  { %v475_v33 = vpop.f32.mrb[0].mxu0  ;;  %v828_v34 = vpop.f32.mrb[0].mxu1 }
 0x12e   :  { %v476_v35 = vadd.f32 %v475_v33, %v3198_v27  ;;  %v829_v36 = vadd.f32 %v828_v34, %v3200_v28  ;;  %v477_v37 = vpop.f32.mrb[1].mxu0  ;;  %v830_v38 = vpop.f32.mrb[1].mxu1 }
 0x12f   :  { %v478_v40 = vadd.f32 %v477_v37, %v3202_v29  ;;  %v831_v41 = vadd.f32 %v830_v38, %v3204_v30  ;;  %v479_v42 = vpop.f32.mrb[2].mxu0  ;;  %v832_v43 = vpop.f32.mrb[2].mxu1 }
 0x130   :  { %v480_v44 = vadd.f32 %v479_v42, %v3198_v27  ;;  %v833_v45 = vadd.f32 %v832_v43, %v3200_v28  ;;  %v481_v46 = vpop.f32.mrb[3].mxu0  ;;  %v834_v47 = vpop.f32.mrb[3].mxu1  ;;  %v1147_v50 = vmax.f32 %v476_v35, 0.0  ;;  %v1149_v51 = vmax.f32 %v829_v36, 0.0 }
 0x131   :  { %v482_v48 = vadd.f32 %v481_v46, %v3202_v29  ;;  %v835_v49 = vadd.f32 %v834_v47, %v3204_v30  ;;  %v1148_v54 = vmax.f32 %v478_v40, 0.0  ;;  %v1150_v55 = vmax.f32 %v831_v41, 0.0 }
 0x132   :  { %v1151_v52 = vmax.f32 %v480_v44, 0.0  ;;  %v1153_v53 = vmax.f32 %v833_v45, 0.0  ;;  %744 = vmatmul.mubr.bf16.gmra.mrb[108].mxu0 %v222_v39  ;;  %1097 = vmatmul.mubr.bf16.gmra.mrb[108].mxu1 %v222_v39  ;;  %v224_v42 = vpack.c.bf16 %v190_v31, %v189_v26 }
 0x133   :  { %v1152_v56 = vmax.f32 %v482_v48, 0.0  ;;  %v1154_v57 = vmax.f32 %v835_v49, 0.0  ;;  %753 = vmatprep.mubr.bf16.mxu0 %v3038_v0  ;;  %1106 = vmatprep.mubr.bf16.mxu1 %v3038_v0 }
 0x134   :  { %v3218_v60 = vpack.c.bf16 %v1151_v52, %v1147_v50  ;;  %v3220_v61 = vpack.c.bf16 %v1153_v53, %v1149_v51 }
 0x135   :  { %v3222_v62 = vpack.c.bf16 %v1152_v56, %v1148_v54  ;;  %v3224_v63 = vpack.c.bf16 %v1154_v57, %v1150_v55  ;;  %v485_v1 = vpop.f32.mrb[4].mxu0  ;;  %v838_v2 = vpop.f32.mrb[4].mxu1 }
 0x136   :  { %v486_v3 = vadd.f32 %v485_v1, %v3198_v27  ;;  %v839_v4 = vadd.f32 %v838_v2, %v3200_v28  ;;  %v487_v5 = vpop.f32.mrb[5].mxu0  ;;  %v840_v6 = vpop.f32.mrb[5].mxu1  ;;  %v191_v2 = vld [vmem:[#allocation2 + $0x1e0] sm:$0xff] }
 0x137   :  { %v488_v8 = vadd.f32 %v487_v5, %v3202_v29  ;;  %v841_v9 = vadd.f32 %v840_v6, %v3204_v30  ;;  %v489_v10 = vpop.f32.mrb[6].mxu0  ;;  %v842_v11 = vpop.f32.mrb[6].mxu1 }
 0x138   :  { %v490_v12 = vadd.f32 %v489_v10, %v3198_v27  ;;  %v843_v13 = vadd.f32 %v842_v11, %v3200_v28  ;;  %v491_v14 = vpop.f32.mrb[7].mxu0  ;;  %v844_v15 = vpop.f32.mrb[7].mxu1  ;;  %v1155_v18 = vmax.f32 %v486_v3, 0.0  ;;  %v1157_v19 = vmax.f32 %v839_v4, 0.0  ;;  %v192_v3 = vld [vmem:[#allocation2 + $0x1e8] sm:$0xff] }
 0x139   :  { %v492_v16 = vadd.f32 %v491_v14, %v3202_v29  ;;  %v845_v17 = vadd.f32 %v844_v15, %v3204_v30  ;;  %v1156_v22 = vmax.f32 %v488_v8, 0.0  ;;  %v1158_v23 = vmax.f32 %v841_v9, 0.0 }
 0x13a   :  { %v1159_v20 = vmax.f32 %v490_v12, 0.0  ;;  %v1161_v21 = vmax.f32 %v843_v13, 0.0  ;;  %754 = vmatmul.mubr.bf16.gmra.mrb[112].mxu0 %v223_v7  ;;  %1107 = vmatmul.mubr.bf16.gmra.mrb[112].mxu1 %v223_v7  ;;  %v225_v14 = vpack.c.bf16 %v192_v3, %v191_v2 }
 0x13b   :  { %v1160_v24 = vmax.f32 %v492_v16, 0.0  ;;  %v1162_v25 = vmax.f32 %v845_v17, 0.0  ;;  %763 = vmatprep.mubr.bf16.mxu0 %v3038_v0  ;;  %1116 = vmatprep.mubr.bf16.mxu1 %v3038_v0 }
 0x13c   :  { %v3236_v32 = vpack.c.bf16 %v1159_v20, %v1155_v18  ;;  %v3238_v33 = vpack.c.bf16 %v1161_v21, %v1157_v19 }
 0x13d   :  { %v3240_v34 = vpack.c.bf16 %v1160_v24, %v1156_v22  ;;  %v3242_v35 = vpack.c.bf16 %v1162_v25, %v1158_v23  ;;  %v495_v36 = vpop.f32.mrb[8].mxu0  ;;  %v848_v37 = vpop.f32.mrb[8].mxu1 }
 0x13e   :  { %v496_v38 = vadd.f32 %v495_v36, %v3198_v27  ;;  %v849_v39 = vadd.f32 %v848_v37, %v3200_v28  ;;  %v497_v40 = vpop.f32.mrb[9].mxu0  ;;  %v850_v41 = vpop.f32.mrb[9].mxu1 }
 0x13f   :  { %v498_v43 = vadd.f32 %v497_v40, %v3202_v29  ;;  %v851_v44 = vadd.f32 %v850_v41, %v3204_v30  ;;  %v499_v45 = vpop.f32.mrb[10].mxu0  ;;  %v852_v46 = vpop.f32.mrb[10].mxu1  ;;  %v193_v41 = vld [vmem:[#allocation2 + $0x1f0] sm:$0xff] }
 0x140   :  { %v500_v47 = vadd.f32 %v499_v45, %v3198_v27  ;;  %v853_v48 = vadd.f32 %v852_v46, %v3200_v28  ;;  %v501_v49 = vpop.f32.mrb[11].mxu0  ;;  %v854_v50 = vpop.f32.mrb[11].mxu1  ;;  %v1163_v53 = vmax.f32 %v496_v38, 0.0  ;;  %v1165_v54 = vmax.f32 %v849_v39, 0.0 }
 0x141   :  { %v502_v51 = vadd.f32 %v501_v49, %v3202_v29  ;;  %v855_v52 = vadd.f32 %v854_v50, %v3204_v30  ;;  %v1164_v57 = vmax.f32 %v498_v43, 0.0  ;;  %v1166_v58 = vmax.f32 %v851_v44, 0.0 }
 0x142   :  { %v1167_v55 = vmax.f32 %v500_v47, 0.0  ;;  %v1169_v56 = vmax.f32 %v853_v48, 0.0  ;;  %764 = vmatmul.mubr.bf16.gmra.mrb[116].mxu0 %v224_v42  ;;  %1117 = vmatmul.mubr.bf16.gmra.mrb[116].mxu1 %v224_v42  ;;  %v194_v42 = vld [vmem:[#allocation2 + $0x1f8] sm:$0xff] }
 0x143   :  { %v1168_v59 = vmax.f32 %v502_v51, 0.0  ;;  %v1170_v1 = vmax.f32 %v855_v52, 0.0  ;;  %773 = vmatprep.mubr.bf16.mxu0 %v3038_v0  ;;  %1126 = vmatprep.mubr.bf16.mxu1 %v3038_v0 }
 0x144   :  { %v3254_v4 = vpack.c.bf16 %v1167_v55, %v1163_v53  ;;  %v3256_v5 = vpack.c.bf16 %v1169_v56, %v1165_v54  ;;  %v226_v53 = vpack.c.bf16 %v194_v42, %v193_v41 }
 0x145   :  { %v3258_v6 = vpack.c.bf16 %v1168_v59, %v1164_v57  ;;  %v3260_v7 = vpack.c.bf16 %v1170_v1, %v1166_v58  ;;  %v505_v8 = vpop.f32.mrb[12].mxu0  ;;  %v858_v9 = vpop.f32.mrb[12].mxu1 }
 0x146   :  { %v506_v10 = vadd.f32 %v505_v8, %v3198_v27  ;;  %v859_v11 = vadd.f32 %v858_v9, %v3200_v28  ;;  %v507_v12 = vpop.f32.mrb[13].mxu0  ;;  %v860_v13 = vpop.f32.mrb[13].mxu1 }
 0x147   :  { %v508_v15 = vadd.f32 %v507_v12, %v3202_v29  ;;  %v861_v16 = vadd.f32 %v860_v13, %v3204_v30  ;;  %v509_v17 = vpop.f32.mrb[14].mxu0  ;;  %v862_v18 = vpop.f32.mrb[14].mxu1 }
 0x148   :  { %v510_v19 = vadd.f32 %v509_v17, %v3198_v27  ;;  %v863_v20 = vadd.f32 %v862_v18, %v3200_v28  ;;  %v511_v21 = vpop.f32.mrb[15].mxu0  ;;  %v864_v22 = vpop.f32.mrb[15].mxu1  ;;  %v1171_v25 = vmax.f32 %v506_v10, 0.0  ;;  %v1173_v26 = vmax.f32 %v859_v11, 0.0 }
 0x149   :  { %v512_v23 = vadd.f32 %v511_v21, %v3202_v29  ;;  %v865_v24 = vadd.f32 %v864_v22, %v3204_v30  ;;  %v1172_v37 = vmax.f32 %v508_v15, 0.0  ;;  %v1174_v38 = vmax.f32 %v861_v16, 0.0 }
 0x14a   :  { %v1175_v31 = vmax.f32 %v510_v19, 0.0  ;;  %v1177_v36 = vmax.f32 %v863_v20, 0.0  ;;  %774 = vmatmul.mubr.bf16.gmra.mrb[120].mxu0 %v225_v14  ;;  %1127 = vmatmul.mubr.bf16.gmra.mrb[120].mxu1 %v225_v14 }
 0x14b   :  { %v1176_v39 = vmax.f32 %v512_v23, 0.0  ;;  %v1178_v40 = vmax.f32 %v865_v24, 0.0  ;;  %783 = vmatprep.mubr.bf16.mxu0 %v3038_v0  ;;  %1136 = vmatprep.mubr.bf16.mxu1 %v3038_v0 }
 0x14c   :  { %v3272_v43 = vpack.c.bf16 %v1175_v31, %v1171_v25  ;;  %v3274_v44 = vpack.c.bf16 %v1177_v36, %v1173_v26 }
 0x14d   :  { %v3276_v45 = vpack.c.bf16 %v1176_v39, %v1172_v37  ;;  %v3278_v46 = vpack.c.bf16 %v1178_v40, %v1174_v38  ;;  %v515_v47 = vpop.f32.mrb[16].mxu0  ;;  %v868_v48 = vpop.f32.mrb[16].mxu1 }
 0x14e   :  { %v516_v49 = vadd.f32 %v515_v47, %v3198_v27  ;;  %v869_v50 = vadd.f32 %v868_v48, %v3200_v28  ;;  %v517_v51 = vpop.f32.mrb[17].mxu0  ;;  %v870_v52 = vpop.f32.mrb[17].mxu1 }
 0x14f   :  { %v518_v0 = vadd.f32 %v517_v51, %v3202_v29  ;;  %v871_v54 = vadd.f32 %v870_v52, %v3204_v30  ;;  %v519_v55 = vpop.f32.mrb[18].mxu0  ;;  %v872_v56 = vpop.f32.mrb[18].mxu1 }
 0x150   :  { %v520_v57 = vadd.f32 %v519_v55, %v3198_v27  ;;  %v873_v58 = vadd.f32 %v872_v56, %v3200_v28  ;;  %v521_v59 = vpop.f32.mrb[19].mxu0  ;;  %v874_v1 = vpop.f32.mrb[19].mxu1  ;;  %v1179_v8 = vmax.f32 %v516_v49, 0.0  ;;  %v1181_v9 = vmax.f32 %v869_v50, 0.0 }
 0x151   :  { %v522_v2 = vadd.f32 %v521_v59, %v3202_v29  ;;  %v875_v3 = vadd.f32 %v874_v1, %v3204_v30  ;;  %v1180_v12 = vmax.f32 %v518_v0, 0.0  ;;  %v1182_v13 = vmax.f32 %v871_v54, 0.0 }
 0x152   :  { %v1183_v10 = vmax.f32 %v520_v57, 0.0  ;;  %v1185_v11 = vmax.f32 %v873_v58, 0.0  ;;  %784 = vmatmul.mubr.bf16.gmra.mrb[124].mxu0 %v226_v53  ;;  %1137 = vmatmul.mubr.bf16.gmra.mrb[124].mxu1 %v226_v53 }
 0x153   :  { %v1184_v14 = vmax.f32 %v522_v2, 0.0  ;;  %v1186_v15 = vmax.f32 %v875_v3, 0.0  ;;  %1883 = vmatprep.mubr.bf16.mxu0 %v3222_v62  ;;  %2172 = vmatprep.mubr.bf16.mxu1 %v3224_v63 }
 0x154   :  { %v3290_v16 = vpack.c.bf16 %v1183_v10, %v1179_v8  ;;  %v3292_v17 = vpack.c.bf16 %v1185_v11, %v1181_v9 }
 0x155   :  { %v3294_v18 = vpack.c.bf16 %v1184_v14, %v1180_v12  ;;  %v3296_v19 = vpack.c.bf16 %v1186_v15, %v1182_v13  ;;  %v525_v20 = vpop.f32.mrb[20].mxu0  ;;  %v878_v21 = vpop.f32.mrb[20].mxu1 }
 0x156   :  { %v526_v22 = vadd.f32 %v525_v20, %v3198_v27  ;;  %v879_v23 = vadd.f32 %v878_v21, %v3200_v28  ;;  %v527_v24 = vpop.f32.mrb[21].mxu0  ;;  %v880_v25 = vpop.f32.mrb[21].mxu1 }
 0x157   :  { %v528_v62 = vadd.f32 %v527_v24, %v3202_v29  ;;  %v881_v63 = vadd.f32 %v880_v25, %v3204_v30  ;;  %v529_v26 = vpop.f32.mrb[22].mxu0  ;;  %v882_v31 = vpop.f32.mrb[22].mxu1 }
 0x158   :  { %v530_v36 = vadd.f32 %v529_v26, %v3198_v27  ;;  %v883_v37 = vadd.f32 %v882_v31, %v3200_v28  ;;  %v531_v38 = vpop.f32.mrb[23].mxu0  ;;  %v884_v39 = vpop.f32.mrb[23].mxu1  ;;  %v1187_v42 = vmax.f32 %v526_v22, 0.0  ;;  %v1189_v47 = vmax.f32 %v879_v23, 0.0 }
 0x159   :  { %v532_v40 = vadd.f32 %v531_v38, %v3202_v29  ;;  %v885_v41 = vadd.f32 %v884_v39, %v3204_v30  ;;  %v1188_v50 = vmax.f32 %v528_v62, 0.0  ;;  %v1190_v51 = vmax.f32 %v881_v63, 0.0 }
 0x15a   :  { %v1191_v48 = vmax.f32 %v530_v36, 0.0  ;;  %v1193_v49 = vmax.f32 %v883_v37, 0.0  ;;  %1884 = vmatmul.mubr.bf16.vlgmr.msra.gmra.mrb[128].mxu0 %v3218_v60  ;;  %2173 = vmatmul.mubr.bf16.vlgmr.msra.gmra.mrb[128].mxu1 %v3220_v61 }
 0x15b   :  { %v1192_v52 = vmax.f32 %v532_v40, 0.0  ;;  %v1194_v53 = vmax.f32 %v885_v41, 0.0  ;;  %1891 = vmatprep.mubr.bf16.mxu0 %v3240_v34  ;;  %2180 = vmatprep.mubr.bf16.mxu1 %v3242_v35 }
 0x15c   :  { %v3310_v0 = vpack.c.bf16 %v1191_v48, %v1187_v42  ;;  %v3312_v54 = vpack.c.bf16 %v1193_v49, %v1189_v47 }
 0x15d   :  { %v3314_v55 = vpack.c.bf16 %v1192_v52, %v1188_v50  ;;  %v3316_v56 = vpack.c.bf16 %v1194_v53, %v1190_v51  ;;  %v535_v57 = vpop.f32.mrb[24].mxu0  ;;  %v888_v60 = vpop.f32.mrb[24].mxu1 }
 0x15e   :  { %v536_v61 = vadd.f32 %v535_v57, %v3198_v27  ;;  %v889_v58 = vadd.f32 %v888_v60, %v3200_v28  ;;  %v537_v59 = vpop.f32.mrb[25].mxu0  ;;  %v890_v1 = vpop.f32.mrb[25].mxu1 }
 0x15f   :  { %v538_v34 = vadd.f32 %v537_v59, %v3202_v29  ;;  %v891_v35 = vadd.f32 %v890_v1, %v3204_v30  ;;  %v539_v2 = vpop.f32.mrb[26].mxu0  ;;  %v892_v3 = vpop.f32.mrb[26].mxu1 }
 0x160   :  { %v540_v8 = vadd.f32 %v539_v2, %v3198_v27  ;;  %v893_v9 = vadd.f32 %v892_v3, %v3200_v28  ;;  %v541_v10 = vpop.f32.mrb[27].mxu0  ;;  %v894_v11 = vpop.f32.mrb[27].mxu1  ;;  %v1195_v14 = vmax.f32 %v536_v61, 0.0  ;;  %v1197_v15 = vmax.f32 %v889_v58, 0.0 }
 0x161   :  { %v542_v12 = vadd.f32 %v541_v10, %v3202_v29  ;;  %v895_v13 = vadd.f32 %v894_v11, %v3204_v30  ;;  %v1196_v22 = vmax.f32 %v538_v34, 0.0  ;;  %v1198_v23 = vmax.f32 %v891_v35, 0.0 }
 0x162   :  { %v1199_v20 = vmax.f32 %v540_v8, 0.0  ;;  %v1201_v21 = vmax.f32 %v893_v9, 0.0  ;;  %1892 = vmatmul.mubr.bf16.gmra.mrb[132].mxu0 %v3236_v32  ;;  %2181 = vmatmul.mubr.bf16.gmra.mrb[132].mxu1 %v3238_v33 }
 0x163   :  { %v1200_v24 = vmax.f32 %v542_v12, 0.0  ;;  %v1202_v25 = vmax.f32 %v895_v13, 0.0  ;;  %1899 = vmatprep.mubr.bf16.mxu0 %v3258_v6  ;;  %2188 = vmatprep.mubr.bf16.mxu1 %v3260_v7 }
 0x164   :  { %v3330_v62 = vpack.c.bf16 %v1199_v20, %v1195_v14  ;;  %v3332_v63 = vpack.c.bf16 %v1201_v21, %v1197_v15 }
 0x165   :  { %v3334_v26 = vpack.c.bf16 %v1200_v24, %v1196_v22  ;;  %v3336_v31 = vpack.c.bf16 %v1202_v25, %v1198_v23  ;;  %v545_v36 = vpop.f32.mrb[28].mxu0  ;;  %v898_v32 = vpop.f32.mrb[28].mxu1 }
 0x166   :  { %v546_v33 = vadd.f32 %v545_v36, %v3198_v27  ;;  %v899_v37 = vadd.f32 %v898_v32, %v3200_v28  ;;  %v547_v38 = vpop.f32.mrb[29].mxu0  ;;  %v900_v39 = vpop.f32.mrb[29].mxu1 }
 0x167   :  { %v548_v6 = vadd.f32 %v547_v38, %v3202_v29  ;;  %v901_v7 = vadd.f32 %v900_v39, %v3204_v30  ;;  %v549_v40 = vpop.f32.mrb[30].mxu0  ;;  %v902_v41 = vpop.f32.mrb[30].mxu1 }
 0x168   :  { %v550_v42 = vadd.f32 %v549_v40, %v3198_v27  ;;  %v903_v47 = vadd.f32 %v902_v41, %v3200_v28  ;;  %v551_v48 = vpop.f32.mrb[31].mxu0  ;;  %v904_v49 = vpop.f32.mrb[31].mxu1  ;;  %v1203_v52 = vmax.f32 %v546_v33, 0.0  ;;  %v1205_v53 = vmax.f32 %v899_v37, 0.0 }
 0x169   :  { %v552_v50 = vadd.f32 %v551_v48, %v3202_v29  ;;  %v905_v51 = vadd.f32 %v904_v49, %v3204_v30  ;;  %v1204_v61 = vmax.f32 %v548_v6, 0.0  ;;  %v1206_v58 = vmax.f32 %v901_v7, 0.0 }
 0x16a   :  { %v1207_v57 = vmax.f32 %v550_v42, 0.0  ;;  %v1209_v60 = vmax.f32 %v903_v47, 0.0  ;;  %1900 = vmatmul.mubr.bf16.gmra.mrb[136].mxu0 %v3254_v4  ;;  %2189 = vmatmul.mubr.bf16.gmra.mrb[136].mxu1 %v3256_v5 }
 0x16b   :  { %v1208_v59 = vmax.f32 %v552_v50, 0.0  ;;  %v1210_v1 = vmax.f32 %v905_v51, 0.0  ;;  %1907 = vmatprep.mubr.bf16.mxu0 %v3276_v45  ;;  %2196 = vmatprep.mubr.bf16.mxu1 %v3278_v46 }
 0x16c   :  { %v3350_v34 = vpack.c.bf16 %v1207_v57, %v1203_v52  ;;  %v3352_v35 = vpack.c.bf16 %v1209_v60, %v1205_v53 }
 0x16d   :  { %v3354_v2 = vpack.c.bf16 %v1208_v59, %v1204_v61  ;;  %v3356_v3 = vpack.c.bf16 %v1210_v1, %v1206_v58  ;;  %v555_v8 = vpop.f32.mrb[32].mxu0  ;;  %v908_v4 = vpop.f32.mrb[32].mxu1 }
 0x16e   :  { %v556_v5 = vadd.f32 %v555_v8, %v3198_v27  ;;  %v909_v9 = vadd.f32 %v908_v4, %v3200_v28  ;;  %v557_v10 = vpop.f32.mrb[33].mxu0  ;;  %v910_v11 = vpop.f32.mrb[33].mxu1 }
 0x16f   :  { %v558_v45 = vadd.f32 %v557_v10, %v3202_v29  ;;  %v911_v46 = vadd.f32 %v910_v11, %v3204_v30  ;;  %v559_v12 = vpop.f32.mrb[34].mxu0  ;;  %v912_v13 = vpop.f32.mrb[34].mxu1 }
 0x170   :  { %v560_v14 = vadd.f32 %v559_v12, %v3198_v27  ;;  %v913_v15 = vadd.f32 %v912_v13, %v3200_v28  ;;  %v561_v20 = vpop.f32.mrb[35].mxu0  ;;  %v914_v21 = vpop.f32.mrb[35].mxu1  ;;  %v1211_v24 = vmax.f32 %v556_v5, 0.0  ;;  %v1213_v25 = vmax.f32 %v909_v9, 0.0 }
 0x171   :  { %v562_v22 = vadd.f32 %v561_v20, %v3202_v29  ;;  %v915_v23 = vadd.f32 %v914_v21, %v3204_v30  ;;  %v1212_v33 = vmax.f32 %v558_v45, 0.0  ;;  %v1214_v37 = vmax.f32 %v911_v46, 0.0 }
 0x172   :  { %v1215_v36 = vmax.f32 %v560_v14, 0.0  ;;  %v1217_v32 = vmax.f32 %v913_v15, 0.0  ;;  %1908 = vmatmul.mubr.bf16.gmra.mrb[140].mxu0 %v3272_v43  ;;  %2197 = vmatmul.mubr.bf16.gmra.mrb[140].mxu1 %v3274_v44 }
 0x173   :  { %v1216_v38 = vmax.f32 %v562_v22, 0.0  ;;  %v1218_v39 = vmax.f32 %v915_v23, 0.0  ;;  %1915 = vmatprep.mubr.bf16.mxu0 %v3294_v18  ;;  %2204 = vmatprep.mubr.bf16.mxu1 %v3296_v19 }
 0x174   :  { %v3370_v6 = vpack.c.bf16 %v1215_v36, %v1211_v24  ;;  %v3372_v7 = vpack.c.bf16 %v1217_v32, %v1213_v25 }
 0x175   :  { %v3374_v40 = vpack.c.bf16 %v1216_v38, %v1212_v33  ;;  %v3376_v41 = vpack.c.bf16 %v1218_v39, %v1214_v37  ;;  %v565_v42 = vpop.f32.mrb[36].mxu0  ;;  %v918_v43 = vpop.f32.mrb[36].mxu1 }
 0x176   :  { %v566_v44 = vadd.f32 %v565_v42, %v3198_v27  ;;  %v919_v47 = vadd.f32 %v918_v43, %v3200_v28  ;;  %v567_v48 = vpop.f32.mrb[37].mxu0  ;;  %v920_v49 = vpop.f32.mrb[37].mxu1 }
 0x177   :  { %v568_v18 = vadd.f32 %v567_v48, %v3202_v29  ;;  %v921_v19 = vadd.f32 %v920_v49, %v3204_v30  ;;  %v569_v50 = vpop.f32.mrb[38].mxu0  ;;  %v922_v51 = vpop.f32.mrb[38].mxu1 }
 0x178   :  { %v570_v52 = vadd.f32 %v569_v50, %v3198_v27  ;;  %v923_v53 = vadd.f32 %v922_v51, %v3200_v28  ;;  %v571_v57 = vpop.f32.mrb[39].mxu0  ;;  %v924_v60 = vpop.f32.mrb[39].mxu1  ;;  %v1219_v59 = vmax.f32 %v566_v44, 0.0  ;;  %v1221_v1 = vmax.f32 %v919_v47, 0.0 }
 0x179   :  { %v572_v61 = vadd.f32 %v571_v57, %v3202_v29  ;;  %v925_v58 = vadd.f32 %v924_v60, %v3204_v30  ;;  %v1220_v5 = vmax.f32 %v568_v18, 0.0  ;;  %v1222_v9 = vmax.f32 %v921_v19, 0.0 }
 0x17a   :  { %v1223_v8 = vmax.f32 %v570_v52, 0.0  ;;  %v1225_v4 = vmax.f32 %v923_v53, 0.0  ;;  %1916 = vmatmul.mubr.bf16.gmra.mrb[144].mxu0 %v3290_v16  ;;  %2205 = vmatmul.mubr.bf16.gmra.mrb[144].mxu1 %v3292_v17 }
 0x17b   :  { %v1224_v10 = vmax.f32 %v572_v61, 0.0  ;;  %v1226_v11 = vmax.f32 %v925_v58, 0.0  ;;  %1923 = vmatprep.mubr.bf16.mxu0 %v3314_v55  ;;  %2212 = vmatprep.mubr.bf16.mxu1 %v3316_v56 }
 0x17c   :  { %v3390_v45 = vpack.c.bf16 %v1223_v8, %v1219_v59  ;;  %v3392_v46 = vpack.c.bf16 %v1225_v4, %v1221_v1 }
 0x17d   :  { %v3394_v12 = vpack.c.bf16 %v1224_v10, %v1220_v5  ;;  %v3396_v13 = vpack.c.bf16 %v1226_v11, %v1222_v9  ;;  %v575_v14 = vpop.f32.mrb[40].mxu0  ;;  %v928_v16 = vpop.f32.mrb[40].mxu1 }
 0x17e   :  { %v576_v17 = vadd.f32 %v575_v14, %v3198_v27  ;;  %v929_v15 = vadd.f32 %v928_v16, %v3200_v28  ;;  %v577_v20 = vpop.f32.mrb[41].mxu0  ;;  %v930_v21 = vpop.f32.mrb[41].mxu1 }
 0x17f   :  { %v578_v55 = vadd.f32 %v577_v20, %v3202_v29  ;;  %v931_v56 = vadd.f32 %v930_v21, %v3204_v30  ;;  %v579_v22 = vpop.f32.mrb[42].mxu0  ;;  %v932_v23 = vpop.f32.mrb[42].mxu1 }
 0x180   :  { %v580_v24 = vadd.f32 %v579_v22, %v3198_v27  ;;  %v933_v25 = vadd.f32 %v932_v23, %v3200_v28  ;;  %v581_v36 = vpop.f32.mrb[43].mxu0  ;;  %v934_v32 = vpop.f32.mrb[43].mxu1  ;;  %v1227_v38 = vmax.f32 %v576_v17, 0.0  ;;  %v1229_v39 = vmax.f32 %v929_v15, 0.0 }
 0x181   :  { %v582_v33 = vadd.f32 %v581_v36, %v3202_v29  ;;  %v935_v37 = vadd.f32 %v934_v32, %v3204_v30  ;;  %v1228_v44 = vmax.f32 %v578_v55, 0.0  ;;  %v1230_v47 = vmax.f32 %v931_v56, 0.0 }
 0x182   :  { %v1231_v42 = vmax.f32 %v580_v24, 0.0  ;;  %v1233_v43 = vmax.f32 %v933_v25, 0.0  ;;  %1924 = vmatmul.mubr.bf16.gmra.mrb[148].mxu0 %v3310_v0  ;;  %2213 = vmatmul.mubr.bf16.gmra.mrb[148].mxu1 %v3312_v54 }
 0x183   :  { %v1232_v48 = vmax.f32 %v582_v33, 0.0  ;;  %v1234_v49 = vmax.f32 %v935_v37, 0.0  ;;  %1931 = vmatprep.mubr.bf16.mxu0 %v3334_v26  ;;  %2220 = vmatprep.mubr.bf16.mxu1 %v3336_v31 }
 0x184   :  { %v3410_v18 = vpack.c.bf16 %v1231_v42, %v1227_v38  ;;  %v3412_v19 = vpack.c.bf16 %v1233_v43, %v1229_v39 }
 0x185   :  { %v3414_v50 = vpack.c.bf16 %v1232_v48, %v1228_v44  ;;  %v3416_v51 = vpack.c.bf16 %v1234_v49, %v1230_v47  ;;  %v585_v52 = vpop.f32.mrb[44].mxu0  ;;  %v938_v0 = vpop.f32.mrb[44].mxu1 }
 0x186   :  { %v586_v54 = vadd.f32 %v585_v52, %v3198_v27  ;;  %v939_v53 = vadd.f32 %v938_v0, %v3200_v28  ;;  %v587_v57 = vpop.f32.mrb[45].mxu0  ;;  %v940_v60 = vpop.f32.mrb[45].mxu1 }
 0x187   :  { %v588_v26 = vadd.f32 %v587_v57, %v3202_v29  ;;  %v941_v31 = vadd.f32 %v940_v60, %v3204_v30  ;;  %v589_v61 = vpop.f32.mrb[46].mxu0  ;;  %v942_v58 = vpop.f32.mrb[46].mxu1 }
 0x188   :  { %v590_v59 = vadd.f32 %v589_v61, %v3198_v27  ;;  %v943_v1 = vadd.f32 %v942_v58, %v3200_v28  ;;  %v591_v8 = vpop.f32.mrb[47].mxu0  ;;  %v944_v4 = vpop.f32.mrb[47].mxu1  ;;  %v1235_v10 = vmax.f32 %v586_v54, 0.0  ;;  %v1237_v11 = vmax.f32 %v939_v53, 0.0 }
 0x189   :  { %v592_v5 = vadd.f32 %v591_v8, %v3202_v29  ;;  %v945_v9 = vadd.f32 %v944_v4, %v3204_v30  ;;  %v1236_v17 = vmax.f32 %v588_v26, 0.0  ;;  %v1238_v15 = vmax.f32 %v941_v31, 0.0 }
 0x18a   :  { %v1239_v14 = vmax.f32 %v590_v59, 0.0  ;;  %v1241_v16 = vmax.f32 %v943_v1, 0.0  ;;  %1932 = vmatmul.mubr.bf16.gmra.mrb[152].mxu0 %v3330_v62  ;;  %2221 = vmatmul.mubr.bf16.gmra.mrb[152].mxu1 %v3332_v63 }
 0x18b   :  { %v1240_v20 = vmax.f32 %v592_v5, 0.0  ;;  %v1242_v21 = vmax.f32 %v945_v9, 0.0  ;;  %1939 = vmatprep.mubr.bf16.mxu0 %v3354_v2  ;;  %2228 = vmatprep.mubr.bf16.mxu1 %v3356_v3 }
 0x18c   :  { %v3430_v55 = vpack.c.bf16 %v1239_v14, %v1235_v10  ;;  %v3432_v56 = vpack.c.bf16 %v1241_v16, %v1237_v11 }
 0x18d   :  { %v3434_v22 = vpack.c.bf16 %v1240_v20, %v1236_v17  ;;  %v3436_v23 = vpack.c.bf16 %v1242_v21, %v1238_v15  ;;  %v595_v24 = vpop.f32.mrb[48].mxu0  ;;  %v948_v62 = vpop.f32.mrb[48].mxu1 }
 0x18e   :  { %v596_v63 = vadd.f32 %v595_v24, %v3198_v27  ;;  %v949_v25 = vadd.f32 %v948_v62, %v3200_v28  ;;  %v597_v36 = vpop.f32.mrb[49].mxu0  ;;  %v950_v32 = vpop.f32.mrb[49].mxu1 }
 0x18f   :  { %v598_v2 = vadd.f32 %v597_v36, %v3202_v29  ;;  %v951_v3 = vadd.f32 %v950_v32, %v3204_v30  ;;  %v599_v33 = vpop.f32.mrb[50].mxu0  ;;  %v952_v37 = vpop.f32.mrb[50].mxu1 }
 0x190   :  { %v600_v38 = vadd.f32 %v599_v33, %v3198_v27  ;;  %v953_v39 = vadd.f32 %v952_v37, %v3200_v28  ;;  %v601_v42 = vpop.f32.mrb[51].mxu0  ;;  %v954_v43 = vpop.f32.mrb[51].mxu1  ;;  %v1243_v48 = vmax.f32 %v596_v63, 0.0  ;;  %v1245_v49 = vmax.f32 %v949_v25, 0.0 }
 0x191   :  { %v602_v44 = vadd.f32 %v601_v42, %v3202_v29  ;;  %v955_v47 = vadd.f32 %v954_v43, %v3204_v30  ;;  %v1244_v54 = vmax.f32 %v598_v2, 0.0  ;;  %v1246_v53 = vmax.f32 %v951_v3, 0.0 }
 0x192   :  { %v1247_v52 = vmax.f32 %v600_v38, 0.0  ;;  %v1249_v0 = vmax.f32 %v953_v39, 0.0  ;;  %1940 = vmatmul.mubr.bf16.gmra.mrb[156].mxu0 %v3350_v34  ;;  %2229 = vmatmul.mubr.bf16.gmra.mrb[156].mxu1 %v3352_v35 }
 0x193   :  { %v1248_v57 = vmax.f32 %v602_v44, 0.0  ;;  %v1250_v60 = vmax.f32 %v955_v47, 0.0  ;;  %1947 = vmatprep.mubr.bf16.mxu0 %v3374_v40  ;;  %2236 = vmatprep.mubr.bf16.mxu1 %v3376_v41 }
 0x194   :  { %v3450_v26 = vpack.c.bf16 %v1247_v52, %v1243_v48  ;;  %v3452_v31 = vpack.c.bf16 %v1249_v0, %v1245_v49 }
 0x195   :  { %v3454_v61 = vpack.c.bf16 %v1248_v57, %v1244_v54  ;;  %v3456_v58 = vpack.c.bf16 %v1250_v60, %v1246_v53  ;;  %v605_v59 = vpop.f32.mrb[52].mxu0  ;;  %v958_v34 = vpop.f32.mrb[52].mxu1 }
 0x196   :  { %v606_v35 = vadd.f32 %v605_v59, %v3198_v27  ;;  %v959_v1 = vadd.f32 %v958_v34, %v3200_v28  ;;  %v607_v8 = vpop.f32.mrb[53].mxu0  ;;  %v960_v4 = vpop.f32.mrb[53].mxu1 }
 0x197   :  { %v608_v40 = vadd.f32 %v607_v8, %v3202_v29  ;;  %v961_v41 = vadd.f32 %v960_v4, %v3204_v30  ;;  %v609_v5 = vpop.f32.mrb[54].mxu0  ;;  %v962_v9 = vpop.f32.mrb[54].mxu1 }
 0x198   :  { %v610_v10 = vadd.f32 %v609_v5, %v3198_v27  ;;  %v963_v11 = vadd.f32 %v962_v9, %v3200_v28  ;;  %v611_v14 = vpop.f32.mrb[55].mxu0  ;;  %v964_v16 = vpop.f32.mrb[55].mxu1  ;;  %v1251_v20 = vmax.f32 %v606_v35, 0.0  ;;  %v1253_v21 = vmax.f32 %v959_v1, 0.0 }
 0x199   :  { %v612_v17 = vadd.f32 %v611_v14, %v3202_v29  ;;  %v965_v15 = vadd.f32 %v964_v16, %v3204_v30  ;;  %v1252_v63 = vmax.f32 %v608_v40, 0.0  ;;  %v1254_v25 = vmax.f32 %v961_v41, 0.0 }
 0x19a   :  { %v1255_v24 = vmax.f32 %v610_v10, 0.0  ;;  %v1257_v62 = vmax.f32 %v963_v11, 0.0  ;;  %1948 = vmatmul.mubr.bf16.gmra.mrb[160].mxu0 %v3370_v6  ;;  %2237 = vmatmul.mubr.bf16.gmra.mrb[160].mxu1 %v3372_v7 }
 0x19b   :  { %v1256_v36 = vmax.f32 %v612_v17, 0.0  ;;  %v1258_v32 = vmax.f32 %v965_v15, 0.0  ;;  %1955 = vmatprep.mubr.bf16.mxu0 %v3394_v12  ;;  %2244 = vmatprep.mubr.bf16.mxu1 %v3396_v13 }
 0x19c   :  { %v3470_v2 = vpack.c.bf16 %v1255_v24, %v1251_v20  ;;  %v3472_v3 = vpack.c.bf16 %v1257_v62, %v1253_v21 }
 0x19d   :  { %v3474_v33 = vpack.c.bf16 %v1256_v36, %v1252_v63  ;;  %v3476_v37 = vpack.c.bf16 %v1258_v32, %v1254_v25  ;;  %v615_v38 = vpop.f32.mrb[56].mxu0  ;;  %v968_v6 = vpop.f32.mrb[56].mxu1 }
 0x19e   :  { %v616_v7 = vadd.f32 %v615_v38, %v3198_v27  ;;  %v969_v39 = vadd.f32 %v968_v6, %v3200_v28  ;;  %v617_v42 = vpop.f32.mrb[57].mxu0  ;;  %v970_v43 = vpop.f32.mrb[57].mxu1 }
 0x19f   :  { %v618_v12 = vadd.f32 %v617_v42, %v3202_v29  ;;  %v971_v13 = vadd.f32 %v970_v43, %v3204_v30  ;;  %v619_v44 = vpop.f32.mrb[58].mxu0  ;;  %v972_v47 = vpop.f32.mrb[58].mxu1 }
 0x1a0   :  { %v620_v48 = vadd.f32 %v619_v44, %v3198_v27  ;;  %v973_v49 = vadd.f32 %v972_v47, %v3200_v28  ;;  %v621_v52 = vpop.f32.mrb[59].mxu0  ;;  %v974_v0 = vpop.f32.mrb[59].mxu1  ;;  %v1259_v57 = vmax.f32 %v616_v7, 0.0  ;;  %v1261_v60 = vmax.f32 %v969_v39, 0.0 }
 0x1a1   :  { %v622_v54 = vadd.f32 %v621_v52, %v3202_v29  ;;  %v975_v53 = vadd.f32 %v974_v0, %v3204_v30  ;;  %v1260_v35 = vmax.f32 %v618_v12, 0.0  ;;  %v1262_v1 = vmax.f32 %v971_v13, 0.0 }
 0x1a2   :  { %v1263_v59 = vmax.f32 %v620_v48, 0.0  ;;  %v1265_v34 = vmax.f32 %v973_v49, 0.0  ;;  %1956 = vmatmul.mubr.bf16.gmra.mrb[164].mxu0 %v3390_v45  ;;  %2245 = vmatmul.mubr.bf16.gmra.mrb[164].mxu1 %v3392_v46 }
 0x1a3   :  { %v1264_v8 = vmax.f32 %v622_v54, 0.0  ;;  %v1266_v4 = vmax.f32 %v975_v53, 0.0  ;;  %1963 = vmatprep.mubr.bf16.mxu0 %v3414_v50  ;;  %2252 = vmatprep.mubr.bf16.mxu1 %v3416_v51 }
 0x1a4   :  { %v3490_v40 = vpack.c.bf16 %v1263_v59, %v1259_v57  ;;  %v3492_v41 = vpack.c.bf16 %v1265_v34, %v1261_v60 }
 0x1a5   :  { %v3494_v5 = vpack.c.bf16 %v1264_v8, %v1260_v35  ;;  %v3496_v9 = vpack.c.bf16 %v1266_v4, %v1262_v1  ;;  %v625_v10 = vpop.f32.mrb[60].mxu0  ;;  %v978_v45 = vpop.f32.mrb[60].mxu1 }
 0x1a6   :  { %v626_v46 = vadd.f32 %v625_v10, %v3198_v27  ;;  %v979_v11 = vadd.f32 %v978_v45, %v3200_v28  ;;  %v627_v14 = vpop.f32.mrb[61].mxu0  ;;  %v980_v16 = vpop.f32.mrb[61].mxu1 }
 0x1a7   :  { %v628_v50 = vadd.f32 %v627_v14, %v3202_v29  ;;  %v981_v51 = vadd.f32 %v980_v16, %v3204_v30  ;;  %v629_v17 = vpop.f32.mrb[62].mxu0  ;;  %v982_v15 = vpop.f32.mrb[62].mxu1 }
 0x1a8   :  { %v630_v20 = vadd.f32 %v629_v17, %v3198_v27  ;;  %v983_v21 = vadd.f32 %v982_v15, %v3200_v28  ;;  %v631_v24 = vpop.f32.mrb[63].mxu0  ;;  %v984_v62 = vpop.f32.mrb[63].mxu1  ;;  %v1267_v36 = vmax.f32 %v626_v46, 0.0  ;;  %v1269_v32 = vmax.f32 %v979_v11, 0.0 }
 0x1a9   :  { %v632_v63 = vadd.f32 %v631_v24, %v3202_v29  ;;  %v985_v25 = vadd.f32 %v984_v62, %v3204_v30  ;;  %v1268_v7 = vmax.f32 %v628_v50, 0.0  ;;  %v1270_v39 = vmax.f32 %v981_v51, 0.0 }
 0x1aa   :  { %v1271_v38 = vmax.f32 %v630_v20, 0.0  ;;  %v1273_v6 = vmax.f32 %v983_v21, 0.0  ;;  %1964 = vmatmul.mubr.bf16.gmra.mrb[168].mxu0 %v3410_v18  ;;  %2253 = vmatmul.mubr.bf16.gmra.mrb[168].mxu1 %v3412_v19 }
 0x1ab   :  { %v1272_v42 = vmax.f32 %v632_v63, 0.0  ;;  %v1274_v43 = vmax.f32 %v985_v25, 0.0  ;;  %1971 = vmatprep.mubr.bf16.mxu0 %v3434_v22  ;;  %2260 = vmatprep.mubr.bf16.mxu1 %v3436_v23 }
 0x1ac   :  { %v3510_v12 = vpack.c.bf16 %v1271_v38, %v1267_v36  ;;  %v3512_v13 = vpack.c.bf16 %v1273_v6, %v1269_v32 }
 0x1ad   :  { %v3514_v44 = vpack.c.bf16 %v1272_v42, %v1268_v7  ;;  %v3516_v47 = vpack.c.bf16 %v1274_v43, %v1270_v39  ;;  %v635_v48 = vpop.f32.mrb[64].mxu0  ;;  %v988_v18 = vpop.f32.mrb[64].mxu1 }
 0x1ae   :  { %v636_v19 = vadd.f32 %v635_v48, %v3198_v27  ;;  %v989_v49 = vadd.f32 %v988_v18, %v3200_v28  ;;  %v637_v52 = vpop.f32.mrb[65].mxu0  ;;  %v990_v0 = vpop.f32.mrb[65].mxu1 }
 0x1af   :  { %v638_v22 = vadd.f32 %v637_v52, %v3202_v29  ;;  %v991_v23 = vadd.f32 %v990_v0, %v3204_v30  ;;  %v639_v54 = vpop.f32.mrb[66].mxu0  ;;  %v992_v53 = vpop.f32.mrb[66].mxu1 }
 0x1b0   :  { %v640_v57 = vadd.f32 %v639_v54, %v3198_v27  ;;  %v993_v60 = vadd.f32 %v992_v53, %v3200_v28  ;;  %v641_v59 = vpop.f32.mrb[67].mxu0  ;;  %v994_v34 = vpop.f32.mrb[67].mxu1  ;;  %v1275_v8 = vmax.f32 %v636_v19, 0.0  ;;  %v1277_v4 = vmax.f32 %v989_v49, 0.0 }
 0x1b1   :  { %v642_v35 = vadd.f32 %v641_v59, %v3202_v29  ;;  %v995_v1 = vadd.f32 %v994_v34, %v3204_v30  ;;  %v1276_v46 = vmax.f32 %v638_v22, 0.0  ;;  %v1278_v11 = vmax.f32 %v991_v23, 0.0 }
 0x1b2   :  { %v1279_v10 = vmax.f32 %v640_v57, 0.0  ;;  %v1281_v45 = vmax.f32 %v993_v60, 0.0  ;;  %1972 = vmatmul.mubr.bf16.gmra.mrb[172].mxu0 %v3430_v55  ;;  %2261 = vmatmul.mubr.bf16.gmra.mrb[172].mxu1 %v3432_v56 }
 0x1b3   :  { %v1280_v14 = vmax.f32 %v642_v35, 0.0  ;;  %v1282_v16 = vmax.f32 %v995_v1, 0.0  ;;  %1979 = vmatprep.mubr.bf16.mxu0 %v3454_v61  ;;  %2268 = vmatprep.mubr.bf16.mxu1 %v3456_v58 }
 0x1b4   :  { %v3530_v50 = vpack.c.bf16 %v1279_v10, %v1275_v8  ;;  %v3532_v51 = vpack.c.bf16 %v1281_v45, %v1277_v4 }
 0x1b5   :  { %v3534_v17 = vpack.c.bf16 %v1280_v14, %v1276_v46  ;;  %v3536_v15 = vpack.c.bf16 %v1282_v16, %v1278_v11  ;;  %v645_v20 = vpop.f32.mrb[68].mxu0  ;;  %v998_v55 = vpop.f32.mrb[68].mxu1 }
 0x1b6   :  { %v646_v56 = vadd.f32 %v645_v20, %v3198_v27  ;;  %v999_v21 = vadd.f32 %v998_v55, %v3200_v28  ;;  %v647_v24 = vpop.f32.mrb[69].mxu0  ;;  %v1000_v62 = vpop.f32.mrb[69].mxu1 }
 0x1b7   :  { %v648_v61 = vadd.f32 %v647_v24, %v3202_v29  ;;  %v1001_v58 = vadd.f32 %v1000_v62, %v3204_v30  ;;  %v649_v63 = vpop.f32.mrb[70].mxu0  ;;  %v1002_v25 = vpop.f32.mrb[70].mxu1 }
 0x1b8   :  { %v650_v36 = vadd.f32 %v649_v63, %v3198_v27  ;;  %v1003_v32 = vadd.f32 %v1002_v25, %v3200_v28  ;;  %v651_v38 = vpop.f32.mrb[71].mxu0  ;;  %v1004_v6 = vpop.f32.mrb[71].mxu1  ;;  %v1283_v42 = vmax.f32 %v646_v56, 0.0  ;;  %v1285_v43 = vmax.f32 %v999_v21, 0.0 }
 0x1b9   :  { %v652_v7 = vadd.f32 %v651_v38, %v3202_v29  ;;  %v1005_v39 = vadd.f32 %v1004_v6, %v3204_v30  ;;  %v1284_v19 = vmax.f32 %v648_v61, 0.0  ;;  %v1286_v49 = vmax.f32 %v1001_v58, 0.0 }
 0x1ba   :  { %v1287_v48 = vmax.f32 %v650_v36, 0.0  ;;  %v1289_v18 = vmax.f32 %v1003_v32, 0.0  ;;  %1980 = vmatmul.mubr.bf16.gmra.mrb[176].mxu0 %v3450_v26  ;;  %2269 = vmatmul.mubr.bf16.gmra.mrb[176].mxu1 %v3452_v31 }
 0x1bb   :  { %v1288_v52 = vmax.f32 %v652_v7, 0.0  ;;  %v1290_v0 = vmax.f32 %v1005_v39, 0.0  ;;  %1987 = vmatprep.mubr.bf16.mxu0 %v3474_v33  ;;  %2276 = vmatprep.mubr.bf16.mxu1 %v3476_v37 }
 0x1bc   :  { %v3550_v22 = vpack.c.bf16 %v1287_v48, %v1283_v42  ;;  %v3552_v23 = vpack.c.bf16 %v1289_v18, %v1285_v43 }
 0x1bd   :  { %v3554_v54 = vpack.c.bf16 %v1288_v52, %v1284_v19  ;;  %v3556_v53 = vpack.c.bf16 %v1290_v0, %v1286_v49  ;;  %v655_v57 = vpop.f32.mrb[72].mxu0  ;;  %v1008_v26 = vpop.f32.mrb[72].mxu1 }
 0x1be   :  { %v656_v31 = vadd.f32 %v655_v57, %v3198_v27  ;;  %v1009_v60 = vadd.f32 %v1008_v26, %v3200_v28  ;;  %v657_v59 = vpop.f32.mrb[73].mxu0  ;;  %v1010_v34 = vpop.f32.mrb[73].mxu1 }
 0x1bf   :  { %v658_v33 = vadd.f32 %v657_v59, %v3202_v29  ;;  %v1011_v37 = vadd.f32 %v1010_v34, %v3204_v30  ;;  %v659_v35 = vpop.f32.mrb[74].mxu0  ;;  %v1012_v1 = vpop.f32.mrb[74].mxu1 }
 0x1c0   :  { %v660_v8 = vadd.f32 %v659_v35, %v3198_v27  ;;  %v1013_v4 = vadd.f32 %v1012_v1, %v3200_v28  ;;  %v661_v10 = vpop.f32.mrb[75].mxu0  ;;  %v1014_v45 = vpop.f32.mrb[75].mxu1  ;;  %v1291_v14 = vmax.f32 %v656_v31, 0.0  ;;  %v1293_v16 = vmax.f32 %v1009_v60, 0.0 }
 0x1c1   :  { %v662_v46 = vadd.f32 %v661_v10, %v3202_v29  ;;  %v1015_v11 = vadd.f32 %v1014_v45, %v3204_v30  ;;  %v1292_v56 = vmax.f32 %v658_v33, 0.0  ;;  %v1294_v21 = vmax.f32 %v1011_v37, 0.0 }
 0x1c2   :  { %v1295_v20 = vmax.f32 %v660_v8, 0.0  ;;  %v1297_v55 = vmax.f32 %v1013_v4, 0.0  ;;  %1988 = vmatmul.mubr.bf16.gmra.mrb[180].mxu0 %v3470_v2  ;;  %2277 = vmatmul.mubr.bf16.gmra.mrb[180].mxu1 %v3472_v3 }
 0x1c3   :  { %v1296_v24 = vmax.f32 %v662_v46, 0.0  ;;  %v1298_v62 = vmax.f32 %v1015_v11, 0.0  ;;  %1995 = vmatprep.mubr.bf16.mxu0 %v3494_v5  ;;  %2284 = vmatprep.mubr.bf16.mxu1 %v3496_v9 }
 0x1c4   :  { %v3570_v61 = vpack.c.bf16 %v1295_v20, %v1291_v14  ;;  %v3572_v58 = vpack.c.bf16 %v1297_v55, %v1293_v16 }
 0x1c5   :  { %v3574_v63 = vpack.c.bf16 %v1296_v24, %v1292_v56  ;;  %v3576_v25 = vpack.c.bf16 %v1298_v62, %v1294_v21  ;;  %v665_v36 = vpop.f32.mrb[76].mxu0  ;;  %v1018_v2 = vpop.f32.mrb[76].mxu1 }
 0x1c6   :  { %v666_v3 = vadd.f32 %v665_v36, %v3198_v27  ;;  %v1019_v32 = vadd.f32 %v1018_v2, %v3200_v28  ;;  %v667_v38 = vpop.f32.mrb[77].mxu0  ;;  %v1020_v6 = vpop.f32.mrb[77].mxu1 }
 0x1c7   :  { %v668_v5 = vadd.f32 %v667_v38, %v3202_v29  ;;  %v1021_v9 = vadd.f32 %v1020_v6, %v3204_v30  ;;  %v669_v7 = vpop.f32.mrb[78].mxu0  ;;  %v1022_v39 = vpop.f32.mrb[78].mxu1 }
 0x1c8   :  { %v670_v42 = vadd.f32 %v669_v7, %v3198_v27  ;;  %v1023_v43 = vadd.f32 %v1022_v39, %v3200_v28  ;;  %v671_v48 = vpop.f32.mrb[79].mxu0  ;;  %v1024_v18 = vpop.f32.mrb[79].mxu1  ;;  %v1299_v52 = vmax.f32 %v666_v3, 0.0  ;;  %v1301_v0 = vmax.f32 %v1019_v32, 0.0 }
 0x1c9   :  { %v672_v19 = vadd.f32 %v671_v48, %v3202_v29  ;;  %v1025_v49 = vadd.f32 %v1024_v18, %v3204_v30  ;;  %v1300_v31 = vmax.f32 %v668_v5, 0.0  ;;  %v1302_v60 = vmax.f32 %v1021_v9, 0.0 }
 0x1ca   :  { %v1303_v57 = vmax.f32 %v670_v42, 0.0  ;;  %v1305_v26 = vmax.f32 %v1023_v43, 0.0  ;;  %1996 = vmatmul.mubr.bf16.gmra.mrb[184].mxu0 %v3490_v40  ;;  %2285 = vmatmul.mubr.bf16.gmra.mrb[184].mxu1 %v3492_v41 }
 0x1cb   :  { %v1304_v59 = vmax.f32 %v672_v19, 0.0  ;;  %v1306_v34 = vmax.f32 %v1025_v49, 0.0  ;;  %2003 = vmatprep.mubr.bf16.mxu0 %v3514_v44  ;;  %2292 = vmatprep.mubr.bf16.mxu1 %v3516_v47 }
 0x1cc   :  { %v3590_v33 = vpack.c.bf16 %v1303_v57, %v1299_v52  ;;  %v3592_v37 = vpack.c.bf16 %v1305_v26, %v1301_v0 }
 0x1cd   :  { %v3594_v35 = vpack.c.bf16 %v1304_v59, %v1300_v31  ;;  %v3596_v1 = vpack.c.bf16 %v1306_v34, %v1302_v60  ;;  %v675_v8 = vpop.f32.mrb[80].mxu0  ;;  %v1028_v40 = vpop.f32.mrb[80].mxu1 }
 0x1ce   :  { %v676_v41 = vadd.f32 %v675_v8, %v3198_v27  ;;  %v1029_v4 = vadd.f32 %v1028_v40, %v3200_v28  ;;  %v677_v10 = vpop.f32.mrb[81].mxu0  ;;  %v1030_v45 = vpop.f32.mrb[81].mxu1 }
 0x1cf   :  { %v678_v44 = vadd.f32 %v677_v10, %v3202_v29  ;;  %v1031_v47 = vadd.f32 %v1030_v45, %v3204_v30  ;;  %v679_v46 = vpop.f32.mrb[82].mxu0  ;;  %v1032_v11 = vpop.f32.mrb[82].mxu1 }
 0x1d0   :  { %v680_v14 = vadd.f32 %v679_v46, %v3198_v27  ;;  %v1033_v16 = vadd.f32 %v1032_v11, %v3200_v28  ;;  %v681_v20 = vpop.f32.mrb[83].mxu0  ;;  %v1034_v55 = vpop.f32.mrb[83].mxu1  ;;  %v1307_v24 = vmax.f32 %v676_v41, 0.0  ;;  %v1309_v62 = vmax.f32 %v1029_v4, 0.0 }
 0x1d1   :  { %v682_v56 = vadd.f32 %v681_v20, %v3202_v29  ;;  %v1035_v21 = vadd.f32 %v1034_v55, %v3204_v30  ;;  %v1308_v3 = vmax.f32 %v678_v44, 0.0  ;;  %v1310_v32 = vmax.f32 %v1031_v47, 0.0 }
 0x1d2   :  { %v1311_v36 = vmax.f32 %v680_v14, 0.0  ;;  %v1313_v2 = vmax.f32 %v1033_v16, 0.0  ;;  %2004 = vmatmul.mubr.bf16.gmra.mrb[188].mxu0 %v3510_v12  ;;  %2293 = vmatmul.mubr.bf16.gmra.mrb[188].mxu1 %v3512_v13 }
 0x1d3   :  { %v1312_v38 = vmax.f32 %v682_v56, 0.0  ;;  %v1314_v6 = vmax.f32 %v1035_v21, 0.0  ;;  %2011 = vmatprep.mubr.bf16.mxu0 %v3534_v17  ;;  %2300 = vmatprep.mubr.bf16.mxu1 %v3536_v15 }
 0x1d4   :  { %v3610_v5 = vpack.c.bf16 %v1311_v36, %v1307_v24  ;;  %v3612_v9 = vpack.c.bf16 %v1313_v2, %v1309_v62 }
 0x1d5   :  { %v3614_v7 = vpack.c.bf16 %v1312_v38, %v1308_v3  ;;  %v3616_v39 = vpack.c.bf16 %v1314_v6, %v1310_v32  ;;  %v685_v42 = vpop.f32.mrb[84].mxu0  ;;  %v1038_v12 = vpop.f32.mrb[84].mxu1 }
 0x1d6   :  { %v686_v13 = vadd.f32 %v685_v42, %v3198_v27  ;;  %v1039_v43 = vadd.f32 %v1038_v12, %v3200_v28  ;;  %v687_v48 = vpop.f32.mrb[85].mxu0  ;;  %v1040_v18 = vpop.f32.mrb[85].mxu1 }
 0x1d7   :  { %v688_v17 = vadd.f32 %v687_v48, %v3202_v29  ;;  %v1041_v15 = vadd.f32 %v1040_v18, %v3204_v30  ;;  %v689_v19 = vpop.f32.mrb[86].mxu0  ;;  %v1042_v49 = vpop.f32.mrb[86].mxu1 }
 0x1d8   :  { %v690_v52 = vadd.f32 %v689_v19, %v3198_v27  ;;  %v1043_v0 = vadd.f32 %v1042_v49, %v3200_v28  ;;  %v691_v57 = vpop.f32.mrb[87].mxu0  ;;  %v1044_v26 = vpop.f32.mrb[87].mxu1  ;;  %v1315_v59 = vmax.f32 %v686_v13, 0.0  ;;  %v1317_v34 = vmax.f32 %v1039_v43, 0.0 }
 0x1d9   :  { %v692_v31 = vadd.f32 %v691_v57, %v3202_v29  ;;  %v1045_v60 = vadd.f32 %v1044_v26, %v3204_v30  ;;  %v1316_v41 = vmax.f32 %v688_v17, 0.0  ;;  %v1318_v4 = vmax.f32 %v1041_v15, 0.0 }
 0x1da   :  { %v1319_v8 = vmax.f32 %v690_v52, 0.0  ;;  %v1321_v40 = vmax.f32 %v1043_v0, 0.0  ;;  %2012 = vmatmul.mubr.bf16.gmra.mrb[192].mxu0 %v3530_v50  ;;  %2301 = vmatmul.mubr.bf16.gmra.mrb[192].mxu1 %v3532_v51 }
 0x1db   :  { %v1320_v10 = vmax.f32 %v692_v31, 0.0  ;;  %v1322_v45 = vmax.f32 %v1045_v60, 0.0  ;;  %2019 = vmatprep.mubr.bf16.mxu0 %v3554_v54  ;;  %2308 = vmatprep.mubr.bf16.mxu1 %v3556_v53 }
 0x1dc   :  { %v3630_v44 = vpack.c.bf16 %v1319_v8, %v1315_v59  ;;  %v3632_v47 = vpack.c.bf16 %v1321_v40, %v1317_v34 }
 0x1dd   :  { %v3634_v46 = vpack.c.bf16 %v1320_v10, %v1316_v41  ;;  %v3636_v11 = vpack.c.bf16 %v1322_v45, %v1318_v4  ;;  %v695_v14 = vpop.f32.mrb[88].mxu0  ;;  %v1048_v50 = vpop.f32.mrb[88].mxu1 }
 0x1de   :  { %v696_v51 = vadd.f32 %v695_v14, %v3198_v27  ;;  %v1049_v16 = vadd.f32 %v1048_v50, %v3200_v28  ;;  %v697_v20 = vpop.f32.mrb[89].mxu0  ;;  %v1050_v55 = vpop.f32.mrb[89].mxu1 }
 0x1df   :  { %v698_v54 = vadd.f32 %v697_v20, %v3202_v29  ;;  %v1051_v53 = vadd.f32 %v1050_v55, %v3204_v30  ;;  %v699_v56 = vpop.f32.mrb[90].mxu0  ;;  %v1052_v21 = vpop.f32.mrb[90].mxu1 }
 0x1e0   :  { %v700_v24 = vadd.f32 %v699_v56, %v3198_v27  ;;  %v1053_v62 = vadd.f32 %v1052_v21, %v3200_v28  ;;  %v701_v36 = vpop.f32.mrb[91].mxu0  ;;  %v1054_v2 = vpop.f32.mrb[91].mxu1  ;;  %v1323_v38 = vmax.f32 %v696_v51, 0.0  ;;  %v1325_v6 = vmax.f32 %v1049_v16, 0.0 }
 0x1e1   :  { %v702_v3 = vadd.f32 %v701_v36, %v3202_v29  ;;  %v1055_v32 = vadd.f32 %v1054_v2, %v3204_v30  ;;  %v1324_v13 = vmax.f32 %v698_v54, 0.0  ;;  %v1326_v43 = vmax.f32 %v1051_v53, 0.0 }
 0x1e2   :  { %v1327_v42 = vmax.f32 %v700_v24, 0.0  ;;  %v1329_v12 = vmax.f32 %v1053_v62, 0.0  ;;  %2020 = vmatmul.mubr.bf16.gmra.mrb[196].mxu0 %v3550_v22  ;;  %2309 = vmatmul.mubr.bf16.gmra.mrb[196].mxu1 %v3552_v23 }
 0x1e3   :  { %v1328_v48 = vmax.f32 %v702_v3, 0.0  ;;  %v1330_v18 = vmax.f32 %v1055_v32, 0.0  ;;  %2027 = vmatprep.mubr.bf16.mxu0 %v3574_v63  ;;  %2316 = vmatprep.mubr.bf16.mxu1 %v3576_v25 }
 0x1e4   :  { %v3650_v17 = vpack.c.bf16 %v1327_v42, %v1323_v38  ;;  %v3652_v15 = vpack.c.bf16 %v1329_v12, %v1325_v6 }
 0x1e5   :  { %v3654_v19 = vpack.c.bf16 %v1328_v48, %v1324_v13  ;;  %v3656_v49 = vpack.c.bf16 %v1330_v18, %v1326_v43  ;;  %v705_v52 = vpop.f32.mrb[92].mxu0  ;;  %v1058_v22 = vpop.f32.mrb[92].mxu1 }
 0x1e6   :  { %v706_v23 = vadd.f32 %v705_v52, %v3198_v27  ;;  %v1059_v0 = vadd.f32 %v1058_v22, %v3200_v28  ;;  %v707_v57 = vpop.f32.mrb[93].mxu0  ;;  %v1060_v26 = vpop.f32.mrb[93].mxu1 }
 0x1e7   :  { %v708_v63 = vadd.f32 %v707_v57, %v3202_v29  ;;  %v1061_v25 = vadd.f32 %v1060_v26, %v3204_v30  ;;  %v709_v31 = vpop.f32.mrb[94].mxu0  ;;  %v1062_v60 = vpop.f32.mrb[94].mxu1 }
 0x1e8   :  { %v710_v59 = vadd.f32 %v709_v31, %v3198_v27  ;;  %v1063_v34 = vadd.f32 %v1062_v60, %v3200_v28  ;;  %v711_v8 = vpop.f32.mrb[95].mxu0  ;;  %v1064_v40 = vpop.f32.mrb[95].mxu1  ;;  %v1331_v10 = vmax.f32 %v706_v23, 0.0  ;;  %v1333_v45 = vmax.f32 %v1059_v0, 0.0 }
 0x1e9   :  { %v712_v41 = vadd.f32 %v711_v8, %v3202_v29  ;;  %v1065_v4 = vadd.f32 %v1064_v40, %v3204_v30  ;;  %v1332_v51 = vmax.f32 %v708_v63, 0.0  ;;  %v1334_v16 = vmax.f32 %v1061_v25, 0.0 }
 0x1ea   :  { %v1335_v14 = vmax.f32 %v710_v59, 0.0  ;;  %v1337_v50 = vmax.f32 %v1063_v34, 0.0  ;;  %2028 = vmatmul.mubr.bf16.gmra.mrb[200].mxu0 %v3570_v61  ;;  %2317 = vmatmul.mubr.bf16.gmra.mrb[200].mxu1 %v3572_v58 }
 0x1eb   :  { %v1336_v20 = vmax.f32 %v712_v41, 0.0  ;;  %v1338_v55 = vmax.f32 %v1065_v4, 0.0  ;;  %2035 = vmatprep.mubr.bf16.mxu0 %v3594_v35  ;;  %2324 = vmatprep.mubr.bf16.mxu1 %v3596_v1 }
 0x1ec   :  { %v3670_v54 = vpack.c.bf16 %v1335_v14, %v1331_v10  ;;  %v3672_v53 = vpack.c.bf16 %v1337_v50, %v1333_v45 }
 0x1ed   :  { %v3674_v56 = vpack.c.bf16 %v1336_v20, %v1332_v51  ;;  %v3676_v21 = vpack.c.bf16 %v1338_v55, %v1334_v16  ;;  %v715_v24 = vpop.f32.mrb[96].mxu0  ;;  %v1068_v61 = vpop.f32.mrb[96].mxu1 }
 0x1ee   :  { %v716_v58 = vadd.f32 %v715_v24, %v3198_v27  ;;  %v1069_v62 = vadd.f32 %v1068_v61, %v3200_v28  ;;  %v717_v36 = vpop.f32.mrb[97].mxu0  ;;  %v1070_v2 = vpop.f32.mrb[97].mxu1 }
 0x1ef   :  { %v718_v35 = vadd.f32 %v717_v36, %v3202_v29  ;;  %v1071_v1 = vadd.f32 %v1070_v2, %v3204_v30  ;;  %v719_v3 = vpop.f32.mrb[98].mxu0  ;;  %v1072_v32 = vpop.f32.mrb[98].mxu1 }
 0x1f0   :  { %v720_v38 = vadd.f32 %v719_v3, %v3198_v27  ;;  %v1073_v6 = vadd.f32 %v1072_v32, %v3200_v28  ;;  %v721_v42 = vpop.f32.mrb[99].mxu0  ;;  %v1074_v12 = vpop.f32.mrb[99].mxu1  ;;  %v1339_v48 = vmax.f32 %v716_v58, 0.0  ;;  %v1341_v18 = vmax.f32 %v1069_v62, 0.0 }
 0x1f1   :  { %v722_v13 = vadd.f32 %v721_v42, %v3202_v29  ;;  %v1075_v43 = vadd.f32 %v1074_v12, %v3204_v30  ;;  %v1340_v23 = vmax.f32 %v718_v35, 0.0  ;;  %v1342_v0 = vmax.f32 %v1071_v1, 0.0 }
 0x1f2   :  { %v1343_v52 = vmax.f32 %v720_v38, 0.0  ;;  %v1345_v22 = vmax.f32 %v1073_v6, 0.0  ;;  %2036 = vmatmul.mubr.bf16.gmra.mrb[204].mxu0 %v3590_v33  ;;  %2325 = vmatmul.mubr.bf16.gmra.mrb[204].mxu1 %v3592_v37 }
 0x1f3   :  { %v1344_v57 = vmax.f32 %v722_v13, 0.0  ;;  %v1346_v26 = vmax.f32 %v1075_v43, 0.0  ;;  %2043 = vmatprep.mubr.bf16.mxu0 %v3614_v7  ;;  %2332 = vmatprep.mubr.bf16.mxu1 %v3616_v39 }
 0x1f4   :  { %v3690_v63 = vpack.c.bf16 %v1343_v52, %v1339_v48  ;;  %v3692_v25 = vpack.c.bf16 %v1345_v22, %v1341_v18 }
 0x1f5   :  { %v3694_v31 = vpack.c.bf16 %v1344_v57, %v1340_v23  ;;  %v3696_v60 = vpack.c.bf16 %v1346_v26, %v1342_v0  ;;  %v725_v59 = vpop.f32.mrb[100].mxu0  ;;  %v1078_v33 = vpop.f32.mrb[100].mxu1 }
 0x1f6   :  { %v726_v37 = vadd.f32 %v725_v59, %v3198_v27  ;;  %v1079_v34 = vadd.f32 %v1078_v33, %v3200_v28  ;;  %v727_v8 = vpop.f32.mrb[101].mxu0  ;;  %v1080_v40 = vpop.f32.mrb[101].mxu1 }
 0x1f7   :  { %v728_v7 = vadd.f32 %v727_v8, %v3202_v29  ;;  %v1081_v39 = vadd.f32 %v1080_v40, %v3204_v30  ;;  %v729_v41 = vpop.f32.mrb[102].mxu0  ;;  %v1082_v4 = vpop.f32.mrb[102].mxu1 }
 0x1f8   :  { %v730_v10 = vadd.f32 %v729_v41, %v3198_v27  ;;  %v1083_v45 = vadd.f32 %v1082_v4, %v3200_v28  ;;  %v731_v14 = vpop.f32.mrb[103].mxu0  ;;  %v1084_v50 = vpop.f32.mrb[103].mxu1  ;;  %v1347_v20 = vmax.f32 %v726_v37, 0.0  ;;  %v1349_v55 = vmax.f32 %v1079_v34, 0.0 }
 0x1f9   :  { %v732_v51 = vadd.f32 %v731_v14, %v3202_v29  ;;  %v1085_v16 = vadd.f32 %v1084_v50, %v3204_v30  ;;  %v1348_v58 = vmax.f32 %v728_v7, 0.0  ;;  %v1350_v62 = vmax.f32 %v1081_v39, 0.0 }
 0x1fa   :  { %v1351_v24 = vmax.f32 %v730_v10, 0.0  ;;  %v1353_v61 = vmax.f32 %v1083_v45, 0.0  ;;  %2044 = vmatmul.mubr.bf16.gmra.mrb[208].mxu0 %v3610_v5  ;;  %2333 = vmatmul.mubr.bf16.gmra.mrb[208].mxu1 %v3612_v9 }
 0x1fb   :  { %v1352_v36 = vmax.f32 %v732_v51, 0.0  ;;  %v1354_v2 = vmax.f32 %v1085_v16, 0.0  ;;  %2051 = vmatprep.mubr.bf16.mxu0 %v3634_v46  ;;  %2340 = vmatprep.mubr.bf16.mxu1 %v3636_v11 }
 0x1fc   :  { %v3710_v35 = vpack.c.bf16 %v1351_v24, %v1347_v20  ;;  %v3712_v1 = vpack.c.bf16 %v1353_v61, %v1349_v55 }
 0x1fd   :  { %v3714_v3 = vpack.c.bf16 %v1352_v36, %v1348_v58  ;;  %v3716_v32 = vpack.c.bf16 %v1354_v2, %v1350_v62  ;;  %v735_v38 = vpop.f32.mrb[104].mxu0  ;;  %v1088_v5 = vpop.f32.mrb[104].mxu1 }
 0x1fe   :  { %v736_v9 = vadd.f32 %v735_v38, %v3198_v27  ;;  %v1089_v6 = vadd.f32 %v1088_v5, %v3200_v28  ;;  %v737_v42 = vpop.f32.mrb[105].mxu0  ;;  %v1090_v12 = vpop.f32.mrb[105].mxu1 }
 0x1ff   :  { %v738_v46 = vadd.f32 %v737_v42, %v3202_v29  ;;  %v1091_v11 = vadd.f32 %v1090_v12, %v3204_v30  ;;  %v739_v13 = vpop.f32.mrb[106].mxu0  ;;  %v1092_v43 = vpop.f32.mrb[106].mxu1 }
 0x200   :  { %v740_v48 = vadd.f32 %v739_v13, %v3198_v27  ;;  %v1093_v18 = vadd.f32 %v1092_v43, %v3200_v28  ;;  %v741_v52 = vpop.f32.mrb[107].mxu0  ;;  %v1094_v22 = vpop.f32.mrb[107].mxu1  ;;  %v1355_v57 = vmax.f32 %v736_v9, 0.0  ;;  %v1357_v26 = vmax.f32 %v1089_v6, 0.0 }
 0x201   :  { %v742_v23 = vadd.f32 %v741_v52, %v3202_v29  ;;  %v1095_v0 = vadd.f32 %v1094_v22, %v3204_v30  ;;  %v1356_v37 = vmax.f32 %v738_v46, 0.0  ;;  %v1358_v34 = vmax.f32 %v1091_v11, 0.0 }
 0x202   :  { %v1359_v59 = vmax.f32 %v740_v48, 0.0  ;;  %v1361_v33 = vmax.f32 %v1093_v18, 0.0  ;;  %2052 = vmatmul.mubr.bf16.gmra.mrb[212].mxu0 %v3630_v44  ;;  %2341 = vmatmul.mubr.bf16.gmra.mrb[212].mxu1 %v3632_v47 }
 0x203   :  { %v1360_v8 = vmax.f32 %v742_v23, 0.0  ;;  %v1362_v40 = vmax.f32 %v1095_v0, 0.0  ;;  %2059 = vmatprep.mubr.bf16.mxu0 %v3654_v19  ;;  %2348 = vmatprep.mubr.bf16.mxu1 %v3656_v49 }
 0x204   :  { %v3730_v7 = vpack.c.bf16 %v1359_v59, %v1355_v57  ;;  %v3732_v39 = vpack.c.bf16 %v1361_v33, %v1357_v26 }
 0x205   :  { %v3734_v41 = vpack.c.bf16 %v1360_v8, %v1356_v37  ;;  %v3736_v4 = vpack.c.bf16 %v1362_v40, %v1358_v34  ;;  %v745_v10 = vpop.f32.mrb[108].mxu0  ;;  %v1098_v44 = vpop.f32.mrb[108].mxu1 }
 0x206   :  { %v746_v47 = vadd.f32 %v745_v10, %v3198_v27  ;;  %v1099_v45 = vadd.f32 %v1098_v44, %v3200_v28  ;;  %v747_v14 = vpop.f32.mrb[109].mxu0  ;;  %v1100_v50 = vpop.f32.mrb[109].mxu1 }
 0x207   :  { %v748_v19 = vadd.f32 %v747_v14, %v3202_v29  ;;  %v1101_v49 = vadd.f32 %v1100_v50, %v3204_v30  ;;  %v749_v51 = vpop.f32.mrb[110].mxu0  ;;  %v1102_v16 = vpop.f32.mrb[110].mxu1 }
 0x208   :  { %v750_v20 = vadd.f32 %v749_v51, %v3198_v27  ;;  %v1103_v55 = vadd.f32 %v1102_v16, %v3200_v28  ;;  %v751_v24 = vpop.f32.mrb[111].mxu0  ;;  %v1104_v61 = vpop.f32.mrb[111].mxu1  ;;  %v1363_v36 = vmax.f32 %v746_v47, 0.0  ;;  %v1365_v2 = vmax.f32 %v1099_v45, 0.0 }
 0x209   :  { %v752_v58 = vadd.f32 %v751_v24, %v3202_v29  ;;  %v1105_v62 = vadd.f32 %v1104_v61, %v3204_v30  ;;  %v1364_v9 = vmax.f32 %v748_v19, 0.0  ;;  %v1366_v6 = vmax.f32 %v1101_v49, 0.0 }
 0x20a   :  { %v1367_v38 = vmax.f32 %v750_v20, 0.0  ;;  %v1369_v5 = vmax.f32 %v1103_v55, 0.0  ;;  %2060 = vmatmul.mubr.bf16.gmra.mrb[216].mxu0 %v3650_v17  ;;  %2349 = vmatmul.mubr.bf16.gmra.mrb[216].mxu1 %v3652_v15 }
 0x20b   :  { %v1368_v42 = vmax.f32 %v752_v58, 0.0  ;;  %v1370_v12 = vmax.f32 %v1105_v62, 0.0  ;;  %2067 = vmatprep.mubr.bf16.mxu0 %v3674_v56  ;;  %2356 = vmatprep.mubr.bf16.mxu1 %v3676_v21 }
 0x20c   :  { %v3750_v46 = vpack.c.bf16 %v1367_v38, %v1363_v36  ;;  %v3752_v11 = vpack.c.bf16 %v1369_v5, %v1365_v2 }
 0x20d   :  { %v3754_v13 = vpack.c.bf16 %v1368_v42, %v1364_v9  ;;  %v3756_v43 = vpack.c.bf16 %v1370_v12, %v1366_v6  ;;  %v755_v48 = vpop.f32.mrb[112].mxu0  ;;  %v1108_v17 = vpop.f32.mrb[112].mxu1 }
 0x20e   :  { %v756_v15 = vadd.f32 %v755_v48, %v3198_v27  ;;  %v1109_v18 = vadd.f32 %v1108_v17, %v3200_v28  ;;  %v757_v52 = vpop.f32.mrb[113].mxu0  ;;  %v1110_v22 = vpop.f32.mrb[113].mxu1 }
 0x20f   :  { %v758_v56 = vadd.f32 %v757_v52, %v3202_v29  ;;  %v1111_v21 = vadd.f32 %v1110_v22, %v3204_v30  ;;  %v759_v23 = vpop.f32.mrb[114].mxu0  ;;  %v1112_v0 = vpop.f32.mrb[114].mxu1 }
 0x210   :  { %v760_v57 = vadd.f32 %v759_v23, %v3198_v27  ;;  %v1113_v26 = vadd.f32 %v1112_v0, %v3200_v28  ;;  %v761_v59 = vpop.f32.mrb[115].mxu0  ;;  %v1114_v33 = vpop.f32.mrb[115].mxu1  ;;  %v1371_v8 = vmax.f32 %v756_v15, 0.0  ;;  %v1373_v40 = vmax.f32 %v1109_v18, 0.0 }
 0x211   :  { %v762_v37 = vadd.f32 %v761_v59, %v3202_v29  ;;  %v1115_v34 = vadd.f32 %v1114_v33, %v3204_v30  ;;  %v1372_v47 = vmax.f32 %v758_v56, 0.0  ;;  %v1374_v45 = vmax.f32 %v1111_v21, 0.0 }
 0x212   :  { %v1375_v10 = vmax.f32 %v760_v57, 0.0  ;;  %v1377_v44 = vmax.f32 %v1113_v26, 0.0  ;;  %2068 = vmatmul.mubr.bf16.gmra.mrb[220].mxu0 %v3670_v54  ;;  %2357 = vmatmul.mubr.bf16.gmra.mrb[220].mxu1 %v3672_v53 }
 0x213   :  { %v1376_v14 = vmax.f32 %v762_v37, 0.0  ;;  %v1378_v50 = vmax.f32 %v1115_v34, 0.0  ;;  %2075 = vmatprep.mubr.bf16.mxu0 %v3694_v31  ;;  %2364 = vmatprep.mubr.bf16.mxu1 %v3696_v60 }
 0x214   :  { %v3770_v19 = vpack.c.bf16 %v1375_v10, %v1371_v8  ;;  %v3772_v49 = vpack.c.bf16 %v1377_v44, %v1373_v40 }
 0x215   :  { %v3774_v51 = vpack.c.bf16 %v1376_v14, %v1372_v47  ;;  %v3776_v16 = vpack.c.bf16 %v1378_v50, %v1374_v45  ;;  %v765_v20 = vpop.f32.mrb[116].mxu0  ;;  %v1118_v54 = vpop.f32.mrb[116].mxu1 }
 0x216   :  { %v766_v53 = vadd.f32 %v765_v20, %v3198_v27  ;;  %v1119_v55 = vadd.f32 %v1118_v54, %v3200_v28  ;;  %v767_v24 = vpop.f32.mrb[117].mxu0  ;;  %v1120_v61 = vpop.f32.mrb[117].mxu1 }
 0x217   :  { %v768_v31 = vadd.f32 %v767_v24, %v3202_v29  ;;  %v1121_v60 = vadd.f32 %v1120_v61, %v3204_v30  ;;  %v769_v58 = vpop.f32.mrb[118].mxu0  ;;  %v1122_v62 = vpop.f32.mrb[118].mxu1 }
 0x218   :  { %v770_v36 = vadd.f32 %v769_v58, %v3198_v27  ;;  %v1123_v2 = vadd.f32 %v1122_v62, %v3200_v28  ;;  %v771_v38 = vpop.f32.mrb[119].mxu0  ;;  %v1124_v5 = vpop.f32.mrb[119].mxu1  ;;  %v1379_v42 = vmax.f32 %v766_v53, 0.0  ;;  %v1381_v12 = vmax.f32 %v1119_v55, 0.0 }
 0x219   :  { %v772_v9 = vadd.f32 %v771_v38, %v3202_v29  ;;  %v1125_v6 = vadd.f32 %v1124_v5, %v3204_v30  ;;  %v1380_v15 = vmax.f32 %v768_v31, 0.0  ;;  %v1382_v18 = vmax.f32 %v1121_v60, 0.0 }
 0x21a   :  { %v1383_v48 = vmax.f32 %v770_v36, 0.0  ;;  %v1385_v17 = vmax.f32 %v1123_v2, 0.0  ;;  %2076 = vmatmul.mubr.bf16.gmra.mrb[224].mxu0 %v3690_v63  ;;  %2365 = vmatmul.mubr.bf16.gmra.mrb[224].mxu1 %v3692_v25 }
 0x21b   :  { %v1384_v52 = vmax.f32 %v772_v9, 0.0  ;;  %v1386_v22 = vmax.f32 %v1125_v6, 0.0  ;;  %2083 = vmatprep.mubr.bf16.mxu0 %v3714_v3  ;;  %2372 = vmatprep.mubr.bf16.mxu1 %v3716_v32 }
 0x21c   :  { %v3790_v56 = vpack.c.bf16 %v1383_v48, %v1379_v42  ;;  %v3792_v21 = vpack.c.bf16 %v1385_v17, %v1381_v12 }
 0x21d   :  { %v3794_v23 = vpack.c.bf16 %v1384_v52, %v1380_v15  ;;  %v3796_v0 = vpack.c.bf16 %v1386_v22, %v1382_v18  ;;  %v775_v57 = vpop.f32.mrb[120].mxu0  ;;  %v1128_v63 = vpop.f32.mrb[120].mxu1 }
 0x21e   :  { %v776_v25 = vadd.f32 %v775_v57, %v3198_v27  ;;  %v1129_v26 = vadd.f32 %v1128_v63, %v3200_v28  ;;  %v777_v59 = vpop.f32.mrb[121].mxu0  ;;  %v1130_v33 = vpop.f32.mrb[121].mxu1 }
 0x21f   :  { %v778_v3 = vadd.f32 %v777_v59, %v3202_v29  ;;  %v1131_v32 = vadd.f32 %v1130_v33, %v3204_v30  ;;  %v779_v37 = vpop.f32.mrb[122].mxu0  ;;  %v1132_v34 = vpop.f32.mrb[122].mxu1 }
 0x220   :  { %v780_v8 = vadd.f32 %v779_v37, %v3198_v27  ;;  %v1133_v40 = vadd.f32 %v1132_v34, %v3200_v28  ;;  %v781_v10 = vpop.f32.mrb[123].mxu0  ;;  %v1134_v44 = vpop.f32.mrb[123].mxu1  ;;  %v1387_v14 = vmax.f32 %v776_v25, 0.0  ;;  %v1389_v50 = vmax.f32 %v1129_v26, 0.0  ;;  %v3841_v34 = vld [vmem:[%s3945_s4] ss:$0 sm:$0xff] }
 0x221   :  { %v782_v47 = vadd.f32 %v781_v10, %v3202_v29  ;;  %v1135_v45 = vadd.f32 %v1134_v44, %v3204_v30  ;;  %v1388_v53 = vmax.f32 %v778_v3, 0.0  ;;  %v1390_v55 = vmax.f32 %v1131_v32, 0.0 }
 0x222   :  { %v1391_v20 = vmax.f32 %v780_v8, 0.0  ;;  %v1393_v54 = vmax.f32 %v1133_v40, 0.0  ;;  %2084 = vmatmul.mubr.bf16.gmra.mrb[228].mxu0 %v3710_v35  ;;  %2373 = vmatmul.mubr.bf16.gmra.mrb[228].mxu1 %v3712_v1 }
 0x223   :  { %v1392_v24 = vmax.f32 %v782_v47, 0.0  ;;  %v1394_v61 = vmax.f32 %v1135_v45, 0.0  ;;  %2091 = vmatprep.mubr.bf16.mxu0 %v3734_v41  ;;  %2380 = vmatprep.mubr.bf16.mxu1 %v3736_v4 }
 0x224   :  { %v3810_v31 = vpack.c.bf16 %v1391_v20, %v1387_v14  ;;  %v3812_v60 = vpack.c.bf16 %v1393_v54, %v1389_v50 }
 0x225   :  { %v3814_v58 = vpack.c.bf16 %v1392_v24, %v1388_v53  ;;  %v3816_v62 = vpack.c.bf16 %v1394_v61, %v1390_v55  ;;  %v785_v36 = vpop.f32.mrb[124].mxu0  ;;  %v1138_v35 = vpop.f32.mrb[124].mxu1 }
 0x226   :  { %v786_v1 = vadd.f32 %v785_v36, %v3198_v27  ;;  %v1139_v2 = vadd.f32 %v1138_v35, %v3200_v28  ;;  %v787_v38 = vpop.f32.mrb[125].mxu0  ;;  %v1140_v5 = vpop.f32.mrb[125].mxu1 }
 0x227   :  { %v788_v41 = vadd.f32 %v787_v38, %v3202_v29  ;;  %v1141_v4 = vadd.f32 %v1140_v5, %v3204_v30  ;;  %v789_v9 = vpop.f32.mrb[126].mxu0  ;;  %v1142_v6 = vpop.f32.mrb[126].mxu1 }
 0x228   :  { %v790_v42 = vadd.f32 %v789_v9, %v3198_v27  ;;  %v1143_v12 = vadd.f32 %v1142_v6, %v3200_v28  ;;  %v791_v48 = vpop.f32.mrb[127].mxu0  ;;  %v1144_v17 = vpop.f32.mrb[127].mxu1  ;;  %v1395_v52 = vmax.f32 %v786_v1, 0.0  ;;  %v1397_v22 = vmax.f32 %v1139_v2, 0.0 }
 0x229   :  { %v792_v15 = vadd.f32 %v791_v48, %v3202_v29  ;;  %v1145_v18 = vadd.f32 %v1144_v17, %v3204_v30  ;;  %v1396_v25 = vmax.f32 %v788_v41, 0.0  ;;  %v1398_v26 = vmax.f32 %v1141_v4, 0.0 }
 0x22a   :  { %v1399_v57 = vmax.f32 %v790_v42, 0.0  ;;  %v1401_v63 = vmax.f32 %v1143_v12, 0.0  ;;  %2092 = vmatmul.mubr.bf16.gmra.mrb[232].mxu0 %v3730_v7  ;;  %2381 = vmatmul.mubr.bf16.gmra.mrb[232].mxu1 %v3732_v39 }
 0x22b   :  { %v1400_v59 = vmax.f32 %v792_v15, 0.0  ;;  %v1402_v27 = vmax.f32 %v1145_v18, 0.0  ;;  %2099 = vmatprep.mubr.bf16.mxu0 %v3754_v13  ;;  %2388 = vmatprep.mubr.bf16.mxu1 %v3756_v43 }
 0x22c   :  { %v3830_v28 = vpack.c.bf16 %v1399_v57, %v1395_v52  ;;  %v3832_v29 = vpack.c.bf16 %v1401_v63, %v1397_v22 }
 0x22d   :  { %v3834_v30 = vpack.c.bf16 %v1400_v59, %v1396_v25  ;;  %v3836_v33 = vpack.c.bf16 %v1402_v27, %v1398_v26  ;;  %v1885_v3 = vpop.f32.mrb[128].mxu0  ;;  %v2174_v7 = vpop.f32.mrb[128].mxu1 }
 0x22e   :  { %v2175_v32 = vadd.f32 %v2174_v7, %v1885_v3  ;;  %v1887_v39 = vpop.f32.mrb[129].mxu0  ;;  %v2176_v37 = vpop.f32.mrb[129].mxu1 }
 0x22f   :  { %v1888_v13 = vpop.f32.mrb[130].mxu0  ;;  %v2177_v43 = vpop.f32.mrb[130].mxu1 }
 0x230   :  { %v2178_v8 = vadd.f32 %v2177_v43, %v1888_v13  ;;  %v1890_v40 = vpop.f32.mrb[131].mxu0  ;;  %v2179_v10 = vpop.f32.mrb[131].mxu1  ;;  %v2631_v44 = vadd.f32 %v3841_v34, %v2175_v32 }
 0x232   :  { %2100 = vmatmul.mubr.bf16.gmra.mrb[236].mxu0 %v3750_v46  ;;  %2389 = vmatmul.mubr.bf16.gmra.mrb[236].mxu1 %v3752_v11  ;;  %2695 = vst [vmem:[#allocation8] sm:$0xff] %v2631_v44  ;;  %v2632_v47 = vadd.f32 %v3841_v34, %v2178_v8 }
 0x233   :  { %2107 = vmatprep.mubr.bf16.mxu0 %v3774_v51  ;;  %2396 = vmatprep.mubr.bf16.mxu1 %v3776_v16 }
 0x234   :  { %2696 = vst [vmem:[#allocation8 + $0x8] sm:$0xff] %v2632_v47 }
 0x235   :  { %v1893_v45 = vpop.f32.mrb[132].mxu0  ;;  %v2182_v14 = vpop.f32.mrb[132].mxu1 }
 0x236   :  { %v2183_v50 = vadd.f32 %v2182_v14, %v1893_v45  ;;  %v1895_v20 = vpop.f32.mrb[133].mxu0  ;;  %v2184_v54 = vpop.f32.mrb[133].mxu1 }
 0x237   :  { %v1896_v53 = vpop.f32.mrb[134].mxu0  ;;  %v2185_v55 = vpop.f32.mrb[134].mxu1 }
 0x238   :  { %v2186_v24 = vadd.f32 %v2185_v55, %v1896_v53  ;;  %v1898_v61 = vpop.f32.mrb[135].mxu0  ;;  %v2187_v46 = vpop.f32.mrb[135].mxu1  ;;  %v2633_v11 = vadd.f32 %v3841_v34, %v2183_v50 }
 0x23a   :  { %2108 = vmatmul.mubr.bf16.gmra.mrb[240].mxu0 %v3770_v19  ;;  %2397 = vmatmul.mubr.bf16.gmra.mrb[240].mxu1 %v3772_v49  ;;  %2697 = vst [vmem:[#allocation8 + $0x10] sm:$0xff] %v2633_v11  ;;  %v2634_v51 = vadd.f32 %v3841_v34, %v2186_v24 }
 0x23b   :  { %2115 = vmatprep.mubr.bf16.mxu0 %v3794_v23  ;;  %2404 = vmatprep.mubr.bf16.mxu1 %v3796_v0 }
 0x23c   :  { %2698 = vst [vmem:[#allocation8 + $0x18] sm:$0xff] %v2634_v51 }
 0x23d   :  { %v1901_v16 = vpop.f32.mrb[136].mxu0  ;;  %v2190_v36 = vpop.f32.mrb[136].mxu1 }
 0x23e   :  { %v2191_v35 = vadd.f32 %v2190_v36, %v1901_v16  ;;  %v1903_v1 = vpop.f32.mrb[137].mxu0  ;;  %v2192_v2 = vpop.f32.mrb[137].mxu1 }
 0x23f   :  { %v1904_v38 = vpop.f32.mrb[138].mxu0  ;;  %v2193_v5 = vpop.f32.mrb[138].mxu1 }
 0x240   :  { %v2194_v41 = vadd.f32 %v2193_v5, %v1904_v38  ;;  %v1906_v4 = vpop.f32.mrb[139].mxu0  ;;  %v2195_v19 = vpop.f32.mrb[139].mxu1  ;;  %v2635_v49 = vadd.f32 %v3841_v34, %v2191_v35 }
 0x242   :  { %2116 = vmatmul.mubr.bf16.gmra.mrb[244].mxu0 %v3790_v56  ;;  %2405 = vmatmul.mubr.bf16.gmra.mrb[244].mxu1 %v3792_v21  ;;  %2699 = vst [vmem:[#allocation8 + $0x20] sm:$0xff] %v2635_v49  ;;  %v2636_v23 = vadd.f32 %v3841_v34, %v2194_v41 }
 0x243   :  { %2123 = vmatprep.mubr.bf16.mxu0 %v3814_v58  ;;  %2412 = vmatprep.mubr.bf16.mxu1 %v3816_v62 }
 0x244   :  { %2700 = vst [vmem:[#allocation8 + $0x28] sm:$0xff] %v2636_v23 }
 0x245   :  { %v1909_v0 = vpop.f32.mrb[140].mxu0  ;;  %v2198_v9 = vpop.f32.mrb[140].mxu1 }
 0x246   :  { %v2199_v6 = vadd.f32 %v2198_v9, %v1909_v0  ;;  %v1911_v42 = vpop.f32.mrb[141].mxu0  ;;  %v2200_v12 = vpop.f32.mrb[141].mxu1 }
 0x247   :  { %v1912_v48 = vpop.f32.mrb[142].mxu0  ;;  %v2201_v17 = vpop.f32.mrb[142].mxu1 }
 0x248   :  { %v2202_v15 = vadd.f32 %v2201_v17, %v1912_v48  ;;  %v1914_v18 = vpop.f32.mrb[143].mxu0  ;;  %v2203_v56 = vpop.f32.mrb[143].mxu1  ;;  %v2637_v21 = vadd.f32 %v3841_v34, %v2199_v6 }
 0x24a   :  { %2124 = vmatmul.mubr.bf16.gmra.mrb[248].mxu0 %v3810_v31  ;;  %2413 = vmatmul.mubr.bf16.gmra.mrb[248].mxu1 %v3812_v60  ;;  %2701 = vst [vmem:[#allocation8 + $0x30] sm:$0xff] %v2637_v21  ;;  %v2638_v58 = vadd.f32 %v3841_v34, %v2202_v15 }
 0x24b   :  { %2131 = vmatprep.mubr.bf16.mxu0 %v3834_v30  ;;  %2420 = vmatprep.mubr.bf16.mxu1 %v3836_v33 }
 0x24c   :  { %2702 = vst [vmem:[#allocation8 + $0x38] sm:$0xff] %v2638_v58 }
 0x24d   :  { %v1917_v62 = vpop.f32.mrb[144].mxu0  ;;  %v2206_v52 = vpop.f32.mrb[144].mxu1 }
 0x24e   :  { %v2207_v22 = vadd.f32 %v2206_v52, %v1917_v62  ;;  %v1919_v57 = vpop.f32.mrb[145].mxu0  ;;  %v2208_v63 = vpop.f32.mrb[145].mxu1 }
 0x24f   :  { %v1920_v25 = vpop.f32.mrb[146].mxu0  ;;  %v2209_v26 = vpop.f32.mrb[146].mxu1 }
 0x250   :  { %v2210_v59 = vadd.f32 %v2209_v26, %v1920_v25  ;;  %v1922_v27 = vpop.f32.mrb[147].mxu0  ;;  %v2211_v31 = vpop.f32.mrb[147].mxu1  ;;  %v2639_v60 = vadd.f32 %v3841_v34, %v2207_v22 }
 0x252   :  { %2132 = vmatmul.mubr.bf16.gmra.mrb[252].mxu0 %v3830_v28  ;;  %2421 = vmatmul.mubr.bf16.gmra.mrb[252].mxu1 %v3832_v29  ;;  %2703 = vst [vmem:[#allocation8 + $0x40] sm:$0xff] %v2639_v60  ;;  %v2640_v30 = vadd.f32 %v3841_v34, %v2210_v59 }
 0x254   :  { %2704 = vst [vmem:[#allocation8 + $0x48] sm:$0xff] %v2640_v30 }
 0x255   :  { %v1925_v33 = vpop.f32.mrb[148].mxu0  ;;  %v2214_v3 = vpop.f32.mrb[148].mxu1 }
 0x256   :  { %v2215_v7 = vadd.f32 %v2214_v3, %v1925_v33  ;;  %v1927_v32 = vpop.f32.mrb[149].mxu0  ;;  %v2216_v39 = vpop.f32.mrb[149].mxu1 }
 0x257   :  { %v1928_v37 = vpop.f32.mrb[150].mxu0  ;;  %v2217_v13 = vpop.f32.mrb[150].mxu1 }
 0x258   :  { %v2218_v43 = vadd.f32 %v2217_v13, %v1928_v37  ;;  %v1930_v8 = vpop.f32.mrb[151].mxu0  ;;  %v2219_v40 = vpop.f32.mrb[151].mxu1  ;;  %v2641_v10 = vadd.f32 %v3841_v34, %v2215_v7 }
 0x25a   :  { %2705 = vst [vmem:[#allocation8 + $0x50] sm:$0xff] %v2641_v10  ;;  %v2642_v28 = vadd.f32 %v3841_v34, %v2218_v43 }
 0x25c   :  { %2706 = vst [vmem:[#allocation8 + $0x58] sm:$0xff] %v2642_v28 }
 0x25d   :  { %v1933_v29 = vpop.f32.mrb[152].mxu0  ;;  %v2222_v44 = vpop.f32.mrb[152].mxu1 }
 0x25e   :  { %v2223_v47 = vadd.f32 %v2222_v44, %v1933_v29  ;;  %v1935_v45 = vpop.f32.mrb[153].mxu0  ;;  %v2224_v14 = vpop.f32.mrb[153].mxu1 }
 0x25f   :  { %v1936_v50 = vpop.f32.mrb[154].mxu0  ;;  %v2225_v20 = vpop.f32.mrb[154].mxu1 }
 0x260   :  { %v2226_v54 = vadd.f32 %v2225_v20, %v1936_v50  ;;  %v1938_v53 = vpop.f32.mrb[155].mxu0  ;;  %v2227_v55 = vpop.f32.mrb[155].mxu1  ;;  %v2643_v24 = vadd.f32 %v3841_v34, %v2223_v47 }
 0x262   :  { %2707 = vst [vmem:[#allocation8 + $0x60] sm:$0xff] %v2643_v24  ;;  %v2644_v61 = vadd.f32 %v3841_v34, %v2226_v54 }
 0x264   :  { %2708 = vst [vmem:[#allocation8 + $0x68] sm:$0xff] %v2644_v61 }
 0x265   :  { %v1941_v46 = vpop.f32.mrb[156].mxu0  ;;  %v2230_v11 = vpop.f32.mrb[156].mxu1 }
 0x266   :  { %v2231_v51 = vadd.f32 %v2230_v11, %v1941_v46  ;;  %v1943_v16 = vpop.f32.mrb[157].mxu0  ;;  %v2232_v36 = vpop.f32.mrb[157].mxu1 }
 0x267   :  { %v1944_v35 = vpop.f32.mrb[158].mxu0  ;;  %v2233_v1 = vpop.f32.mrb[158].mxu1 }
 0x268   :  { %v2234_v2 = vadd.f32 %v2233_v1, %v1944_v35  ;;  %v1946_v38 = vpop.f32.mrb[159].mxu0  ;;  %v2235_v5 = vpop.f32.mrb[159].mxu1  ;;  %v2645_v41 = vadd.f32 %v3841_v34, %v2231_v51 }
 0x26a   :  { %2709 = vst [vmem:[#allocation8 + $0x70] sm:$0xff] %v2645_v41  ;;  %v2646_v4 = vadd.f32 %v3841_v34, %v2234_v2 }
 0x26c   :  { %2710 = vst [vmem:[#allocation8 + $0x78] sm:$0xff] %v2646_v4 }
 0x26d   :  { %v1949_v19 = vpop.f32.mrb[160].mxu0  ;;  %v2238_v49 = vpop.f32.mrb[160].mxu1 }
 0x26e   :  { %v2239_v23 = vadd.f32 %v2238_v49, %v1949_v19  ;;  %v1951_v0 = vpop.f32.mrb[161].mxu0  ;;  %v2240_v9 = vpop.f32.mrb[161].mxu1 }
 0x26f   :  { %v1952_v6 = vpop.f32.mrb[162].mxu0  ;;  %v2241_v42 = vpop.f32.mrb[162].mxu1 }
 0x270   :  { %v2242_v12 = vadd.f32 %v2241_v42, %v1952_v6  ;;  %v1954_v48 = vpop.f32.mrb[163].mxu0  ;;  %v2243_v17 = vpop.f32.mrb[163].mxu1  ;;  %v2647_v15 = vadd.f32 %v3841_v34, %v2239_v23 }
 0x272   :  { %2711 = vst [vmem:[#allocation8 + $0x80] sm:$0xff] %v2647_v15  ;;  %v2648_v18 = vadd.f32 %v3841_v34, %v2242_v12 }
 0x274   :  { %2712 = vst [vmem:[#allocation8 + $0x88] sm:$0xff] %v2648_v18 }
 0x275   :  { %v1957_v56 = vpop.f32.mrb[164].mxu0  ;;  %v2246_v21 = vpop.f32.mrb[164].mxu1 }
 0x276   :  { %v2247_v58 = vadd.f32 %v2246_v21, %v1957_v56  ;;  %v1959_v62 = vpop.f32.mrb[165].mxu0  ;;  %v2248_v52 = vpop.f32.mrb[165].mxu1 }
 0x277   :  { %v1960_v22 = vpop.f32.mrb[166].mxu0  ;;  %v2249_v57 = vpop.f32.mrb[166].mxu1 }
 0x278   :  { %v2250_v63 = vadd.f32 %v2249_v57, %v1960_v22  ;;  %v1962_v25 = vpop.f32.mrb[167].mxu0  ;;  %v2251_v26 = vpop.f32.mrb[167].mxu1  ;;  %v2649_v59 = vadd.f32 %v3841_v34, %v2247_v58 }
 0x27a   :  { %2713 = vst [vmem:[#allocation8 + $0x90] sm:$0xff] %v2649_v59  ;;  %v2650_v27 = vadd.f32 %v3841_v34, %v2250_v63 }
 0x27c   :  { %2714 = vst [vmem:[#allocation8 + $0x98] sm:$0xff] %v2650_v27 }
 0x27d   :  { %v1965_v31 = vpop.f32.mrb[168].mxu0  ;;  %v2254_v60 = vpop.f32.mrb[168].mxu1 }
 0x27e   :  { %v2255_v30 = vadd.f32 %v2254_v60, %v1965_v31  ;;  %v1967_v33 = vpop.f32.mrb[169].mxu0  ;;  %v2256_v3 = vpop.f32.mrb[169].mxu1 }
 0x27f   :  { %v1968_v7 = vpop.f32.mrb[170].mxu0  ;;  %v2257_v32 = vpop.f32.mrb[170].mxu1 }
 0x280   :  { %v2258_v39 = vadd.f32 %v2257_v32, %v1968_v7  ;;  %v1970_v37 = vpop.f32.mrb[171].mxu0  ;;  %v2259_v13 = vpop.f32.mrb[171].mxu1  ;;  %v2651_v43 = vadd.f32 %v3841_v34, %v2255_v30 }
 0x282   :  { %2715 = vst [vmem:[#allocation8 + $0xa0] sm:$0xff] %v2651_v43  ;;  %v2652_v8 = vadd.f32 %v3841_v34, %v2258_v39 }
 0x284   :  { %2716 = vst [vmem:[#allocation8 + $0xa8] sm:$0xff] %v2652_v8 }
 0x285   :  { %v1973_v40 = vpop.f32.mrb[172].mxu0  ;;  %v2262_v10 = vpop.f32.mrb[172].mxu1 }
 0x286   :  { %v2263_v28 = vadd.f32 %v2262_v10, %v1973_v40  ;;  %v1975_v29 = vpop.f32.mrb[173].mxu0  ;;  %v2264_v44 = vpop.f32.mrb[173].mxu1 }
 0x287   :  { %v1976_v47 = vpop.f32.mrb[174].mxu0  ;;  %v2265_v45 = vpop.f32.mrb[174].mxu1 }
 0x288   :  { %v2266_v14 = vadd.f32 %v2265_v45, %v1976_v47  ;;  %v1978_v50 = vpop.f32.mrb[175].mxu0  ;;  %v2267_v20 = vpop.f32.mrb[175].mxu1  ;;  %v2653_v54 = vadd.f32 %v3841_v34, %v2263_v28 }
 0x28a   :  { %2717 = vst [vmem:[#allocation8 + $0xb0] sm:$0xff] %v2653_v54  ;;  %v2654_v53 = vadd.f32 %v3841_v34, %v2266_v14 }
 0x28c   :  { %2718 = vst [vmem:[#allocation8 + $0xb8] sm:$0xff] %v2654_v53 }
 0x28d   :  { %v1981_v55 = vpop.f32.mrb[176].mxu0  ;;  %v2270_v24 = vpop.f32.mrb[176].mxu1 }
 0x28e   :  { %v2271_v61 = vadd.f32 %v2270_v24, %v1981_v55  ;;  %v1983_v46 = vpop.f32.mrb[177].mxu0  ;;  %v2272_v11 = vpop.f32.mrb[177].mxu1 }
 0x28f   :  { %v1984_v51 = vpop.f32.mrb[178].mxu0  ;;  %v2273_v16 = vpop.f32.mrb[178].mxu1 }
 0x290   :  { %v2274_v36 = vadd.f32 %v2273_v16, %v1984_v51  ;;  %v1986_v35 = vpop.f32.mrb[179].mxu0  ;;  %v2275_v1 = vpop.f32.mrb[179].mxu1  ;;  %v2655_v2 = vadd.f32 %v3841_v34, %v2271_v61 }
 0x292   :  { %2719 = vst [vmem:[#allocation8 + $0xc0] sm:$0xff] %v2655_v2  ;;  %v2656_v38 = vadd.f32 %v3841_v34, %v2274_v36 }
 0x294   :  { %2720 = vst [vmem:[#allocation8 + $0xc8] sm:$0xff] %v2656_v38 }
 0x295   :  { %v1989_v5 = vpop.f32.mrb[180].mxu0  ;;  %v2278_v41 = vpop.f32.mrb[180].mxu1 }
 0x296   :  { %v2279_v4 = vadd.f32 %v2278_v41, %v1989_v5  ;;  %v1991_v19 = vpop.f32.mrb[181].mxu0  ;;  %v2280_v49 = vpop.f32.mrb[181].mxu1 }
 0x297   :  { %v1992_v23 = vpop.f32.mrb[182].mxu0  ;;  %v2281_v0 = vpop.f32.mrb[182].mxu1 }
 0x298   :  { %v2282_v9 = vadd.f32 %v2281_v0, %v1992_v23  ;;  %v1994_v6 = vpop.f32.mrb[183].mxu0  ;;  %v2283_v42 = vpop.f32.mrb[183].mxu1  ;;  %v2657_v12 = vadd.f32 %v3841_v34, %v2279_v4 }
 0x29a   :  { %2721 = vst [vmem:[#allocation8 + $0xd0] sm:$0xff] %v2657_v12  ;;  %v2658_v48 = vadd.f32 %v3841_v34, %v2282_v9 }
 0x29c   :  { %2722 = vst [vmem:[#allocation8 + $0xd8] sm:$0xff] %v2658_v48 }
 0x29d   :  { %v1997_v17 = vpop.f32.mrb[184].mxu0  ;;  %v2286_v15 = vpop.f32.mrb[184].mxu1 }
 0x29e   :  { %v2287_v18 = vadd.f32 %v2286_v15, %v1997_v17  ;;  %v1999_v56 = vpop.f32.mrb[185].mxu0  ;;  %v2288_v21 = vpop.f32.mrb[185].mxu1 }
 0x29f   :  { %v2000_v58 = vpop.f32.mrb[186].mxu0  ;;  %v2289_v62 = vpop.f32.mrb[186].mxu1 }
 0x2a0   :  { %v2290_v52 = vadd.f32 %v2289_v62, %v2000_v58  ;;  %v2002_v22 = vpop.f32.mrb[187].mxu0  ;;  %v2291_v57 = vpop.f32.mrb[187].mxu1  ;;  %v2659_v63 = vadd.f32 %v3841_v34, %v2287_v18 }
 0x2a2   :  { %2723 = vst [vmem:[#allocation8 + $0xe0] sm:$0xff] %v2659_v63  ;;  %v2660_v25 = vadd.f32 %v3841_v34, %v2290_v52 }
 0x2a4   :  { %2724 = vst [vmem:[#allocation8 + $0xe8] sm:$0xff] %v2660_v25 }
 0x2a5   :  { %v2005_v26 = vpop.f32.mrb[188].mxu0  ;;  %v2294_v59 = vpop.f32.mrb[188].mxu1 }
 0x2a6   :  { %v2295_v27 = vadd.f32 %v2294_v59, %v2005_v26  ;;  %v2007_v31 = vpop.f32.mrb[189].mxu0  ;;  %v2296_v60 = vpop.f32.mrb[189].mxu1 }
 0x2a7   :  { %v2008_v30 = vpop.f32.mrb[190].mxu0  ;;  %v2297_v33 = vpop.f32.mrb[190].mxu1 }
 0x2a8   :  { %v2298_v3 = vadd.f32 %v2297_v33, %v2008_v30  ;;  %v2010_v7 = vpop.f32.mrb[191].mxu0  ;;  %v2299_v32 = vpop.f32.mrb[191].mxu1  ;;  %v2661_v39 = vadd.f32 %v3841_v34, %v2295_v27 }
 0x2aa   :  { %2725 = vst [vmem:[#allocation8 + $0xf0] sm:$0xff] %v2661_v39  ;;  %v2662_v37 = vadd.f32 %v3841_v34, %v2298_v3 }
 0x2ac   :  { %2726 = vst [vmem:[#allocation8 + $0xf8] sm:$0xff] %v2662_v37 }
 0x2ad   :  { %v2013_v13 = vpop.f32.mrb[192].mxu0  ;;  %v2302_v43 = vpop.f32.mrb[192].mxu1 }
 0x2ae   :  { %v2303_v8 = vadd.f32 %v2302_v43, %v2013_v13  ;;  %v2015_v40 = vpop.f32.mrb[193].mxu0  ;;  %v2304_v10 = vpop.f32.mrb[193].mxu1 }
 0x2af   :  { %v2016_v28 = vpop.f32.mrb[194].mxu0  ;;  %v2305_v29 = vpop.f32.mrb[194].mxu1 }
 0x2b0   :  { %v2306_v44 = vadd.f32 %v2305_v29, %v2016_v28  ;;  %v2018_v47 = vpop.f32.mrb[195].mxu0  ;;  %v2307_v45 = vpop.f32.mrb[195].mxu1  ;;  %v2663_v14 = vadd.f32 %v3841_v34, %v2303_v8 }
 0x2b2   :  { %2727 = vst [vmem:[#allocation8 + $0x100] sm:$0xff] %v2663_v14  ;;  %v2664_v50 = vadd.f32 %v3841_v34, %v2306_v44 }
 0x2b4   :  { %2728 = vst [vmem:[#allocation8 + $0x108] sm:$0xff] %v2664_v50 }
 0x2b5   :  { %v2021_v20 = vpop.f32.mrb[196].mxu0  ;;  %v2310_v54 = vpop.f32.mrb[196].mxu1 }
 0x2b6   :  { %v2311_v53 = vadd.f32 %v2310_v54, %v2021_v20  ;;  %v2023_v55 = vpop.f32.mrb[197].mxu0  ;;  %v2312_v24 = vpop.f32.mrb[197].mxu1 }
 0x2b7   :  { %v2024_v61 = vpop.f32.mrb[198].mxu0  ;;  %v2313_v46 = vpop.f32.mrb[198].mxu1 }
 0x2b8   :  { %v2314_v11 = vadd.f32 %v2313_v46, %v2024_v61  ;;  %v2026_v51 = vpop.f32.mrb[199].mxu0  ;;  %v2315_v16 = vpop.f32.mrb[199].mxu1  ;;  %v2665_v36 = vadd.f32 %v3841_v34, %v2311_v53 }
 0x2ba   :  { %2729 = vst [vmem:[#allocation8 + $0x110] sm:$0xff] %v2665_v36  ;;  %v2666_v35 = vadd.f32 %v3841_v34, %v2314_v11 }
 0x2bc   :  { %2730 = vst [vmem:[#allocation8 + $0x118] sm:$0xff] %v2666_v35 }
 0x2bd   :  { %v2029_v1 = vpop.f32.mrb[200].mxu0  ;;  %v2318_v2 = vpop.f32.mrb[200].mxu1 }
 0x2be   :  { %v2319_v38 = vadd.f32 %v2318_v2, %v2029_v1  ;;  %v2031_v5 = vpop.f32.mrb[201].mxu0  ;;  %v2320_v41 = vpop.f32.mrb[201].mxu1 }
 0x2bf   :  { %v2032_v4 = vpop.f32.mrb[202].mxu0  ;;  %v2321_v19 = vpop.f32.mrb[202].mxu1 }
 0x2c0   :  { %v2322_v49 = vadd.f32 %v2321_v19, %v2032_v4  ;;  %v2034_v23 = vpop.f32.mrb[203].mxu0  ;;  %v2323_v0 = vpop.f32.mrb[203].mxu1  ;;  %v2667_v9 = vadd.f32 %v3841_v34, %v2319_v38 }
 0x2c2   :  { %2731 = vst [vmem:[#allocation8 + $0x120] sm:$0xff] %v2667_v9  ;;  %v2668_v6 = vadd.f32 %v3841_v34, %v2322_v49 }
 0x2c4   :  { %2732 = vst [vmem:[#allocation8 + $0x128] sm:$0xff] %v2668_v6 }
 0x2c5   :  { %v2037_v42 = vpop.f32.mrb[204].mxu0  ;;  %v2326_v12 = vpop.f32.mrb[204].mxu1 }
 0x2c6   :  { %v2327_v48 = vadd.f32 %v2326_v12, %v2037_v42  ;;  %v2039_v17 = vpop.f32.mrb[205].mxu0  ;;  %v2328_v15 = vpop.f32.mrb[205].mxu1 }
 0x2c7   :  { %v2040_v18 = vpop.f32.mrb[206].mxu0  ;;  %v2329_v56 = vpop.f32.mrb[206].mxu1 }
 0x2c8   :  { %v2330_v21 = vadd.f32 %v2329_v56, %v2040_v18  ;;  %v2042_v58 = vpop.f32.mrb[207].mxu0  ;;  %v2331_v62 = vpop.f32.mrb[207].mxu1  ;;  %v2669_v52 = vadd.f32 %v3841_v34, %v2327_v48 }
 0x2ca   :  { %2733 = vst [vmem:[#allocation8 + $0x130] sm:$0xff] %v2669_v52  ;;  %v2670_v22 = vadd.f32 %v3841_v34, %v2330_v21 }
 0x2cc   :  { %2734 = vst [vmem:[#allocation8 + $0x138] sm:$0xff] %v2670_v22 }
 0x2cd   :  { %v2045_v57 = vpop.f32.mrb[208].mxu0  ;;  %v2334_v63 = vpop.f32.mrb[208].mxu1 }
 0x2ce   :  { %v2335_v25 = vadd.f32 %v2334_v63, %v2045_v57  ;;  %v2047_v26 = vpop.f32.mrb[209].mxu0  ;;  %v2336_v59 = vpop.f32.mrb[209].mxu1 }
 0x2cf   :  { %v2048_v27 = vpop.f32.mrb[210].mxu0  ;;  %v2337_v31 = vpop.f32.mrb[210].mxu1 }
 0x2d0   :  { %v2338_v60 = vadd.f32 %v2337_v31, %v2048_v27  ;;  %v2050_v30 = vpop.f32.mrb[211].mxu0  ;;  %v2339_v33 = vpop.f32.mrb[211].mxu1  ;;  %v2671_v3 = vadd.f32 %v3841_v34, %v2335_v25 }
 0x2d2   :  { %2735 = vst [vmem:[#allocation8 + $0x140] sm:$0xff] %v2671_v3  ;;  %v2672_v7 = vadd.f32 %v3841_v34, %v2338_v60 }
 0x2d4   :  { %2736 = vst [vmem:[#allocation8 + $0x148] sm:$0xff] %v2672_v7 }
 0x2d5   :  { %v2053_v32 = vpop.f32.mrb[212].mxu0  ;;  %v2342_v39 = vpop.f32.mrb[212].mxu1 }
 0x2d6   :  { %v2343_v37 = vadd.f32 %v2342_v39, %v2053_v32  ;;  %v2055_v13 = vpop.f32.mrb[213].mxu0  ;;  %v2344_v43 = vpop.f32.mrb[213].mxu1 }
 0x2d7   :  { %v2056_v8 = vpop.f32.mrb[214].mxu0  ;;  %v2345_v40 = vpop.f32.mrb[214].mxu1 }
 0x2d8   :  { %v2346_v10 = vadd.f32 %v2345_v40, %v2056_v8  ;;  %v2058_v28 = vpop.f32.mrb[215].mxu0  ;;  %v2347_v29 = vpop.f32.mrb[215].mxu1  ;;  %v2673_v44 = vadd.f32 %v3841_v34, %v2343_v37 }
 0x2da   :  { %2737 = vst [vmem:[#allocation8 + $0x150] sm:$0xff] %v2673_v44  ;;  %v2674_v47 = vadd.f32 %v3841_v34, %v2346_v10 }
 0x2dc   :  { %2738 = vst [vmem:[#allocation8 + $0x158] sm:$0xff] %v2674_v47 }
 0x2dd   :  { %v2061_v45 = vpop.f32.mrb[216].mxu0  ;;  %v2350_v14 = vpop.f32.mrb[216].mxu1 }
 0x2de   :  { %v2351_v50 = vadd.f32 %v2350_v14, %v2061_v45  ;;  %v2063_v20 = vpop.f32.mrb[217].mxu0  ;;  %v2352_v54 = vpop.f32.mrb[217].mxu1 }
 0x2df   :  { %v2064_v53 = vpop.f32.mrb[218].mxu0  ;;  %v2353_v55 = vpop.f32.mrb[218].mxu1 }
 0x2e0   :  { %v2354_v24 = vadd.f32 %v2353_v55, %v2064_v53  ;;  %v2066_v61 = vpop.f32.mrb[219].mxu0  ;;  %v2355_v46 = vpop.f32.mrb[219].mxu1  ;;  %v2675_v11 = vadd.f32 %v3841_v34, %v2351_v50 }
 0x2e2   :  { %2739 = vst [vmem:[#allocation8 + $0x160] sm:$0xff] %v2675_v11  ;;  %v2676_v51 = vadd.f32 %v3841_v34, %v2354_v24 }
 0x2e4   :  { %2740 = vst [vmem:[#allocation8 + $0x168] sm:$0xff] %v2676_v51 }
 0x2e5   :  { %v2069_v16 = vpop.f32.mrb[220].mxu0  ;;  %v2358_v36 = vpop.f32.mrb[220].mxu1 }
 0x2e6   :  { %v2359_v35 = vadd.f32 %v2358_v36, %v2069_v16  ;;  %v2071_v1 = vpop.f32.mrb[221].mxu0  ;;  %v2360_v2 = vpop.f32.mrb[221].mxu1 }
 0x2e7   :  { %v2072_v38 = vpop.f32.mrb[222].mxu0  ;;  %v2361_v5 = vpop.f32.mrb[222].mxu1 }
 0x2e8   :  { %v2362_v41 = vadd.f32 %v2361_v5, %v2072_v38  ;;  %v2074_v4 = vpop.f32.mrb[223].mxu0  ;;  %v2363_v19 = vpop.f32.mrb[223].mxu1  ;;  %v2677_v49 = vadd.f32 %v3841_v34, %v2359_v35 }
 0x2ea   :  { %2741 = vst [vmem:[#allocation8 + $0x170] sm:$0xff] %v2677_v49  ;;  %v2678_v23 = vadd.f32 %v3841_v34, %v2362_v41 }
 0x2ec   :  { %2742 = vst [vmem:[#allocation8 + $0x178] sm:$0xff] %v2678_v23 }
 0x2ed   :  { %v2077_v0 = vpop.f32.mrb[224].mxu0  ;;  %v2366_v9 = vpop.f32.mrb[224].mxu1 }
 0x2ee   :  { %v2367_v6 = vadd.f32 %v2366_v9, %v2077_v0  ;;  %v2079_v42 = vpop.f32.mrb[225].mxu0  ;;  %v2368_v12 = vpop.f32.mrb[225].mxu1 }
 0x2ef   :  { %v2080_v48 = vpop.f32.mrb[226].mxu0  ;;  %v2369_v17 = vpop.f32.mrb[226].mxu1 }
 0x2f0   :  { %v2370_v15 = vadd.f32 %v2369_v17, %v2080_v48  ;;  %v2082_v18 = vpop.f32.mrb[227].mxu0  ;;  %v2371_v56 = vpop.f32.mrb[227].mxu1  ;;  %v2679_v21 = vadd.f32 %v3841_v34, %v2367_v6 }
 0x2f2   :  { %2743 = vst [vmem:[#allocation8 + $0x180] sm:$0xff] %v2679_v21  ;;  %v2680_v58 = vadd.f32 %v3841_v34, %v2370_v15 }
 0x2f4   :  { %2744 = vst [vmem:[#allocation8 + $0x188] sm:$0xff] %v2680_v58 }
 0x2f5   :  { %v2085_v62 = vpop.f32.mrb[228].mxu0  ;;  %v2374_v52 = vpop.f32.mrb[228].mxu1 }
 0x2f6   :  { %v2375_v22 = vadd.f32 %v2374_v52, %v2085_v62  ;;  %v2087_v57 = vpop.f32.mrb[229].mxu0  ;;  %v2376_v63 = vpop.f32.mrb[229].mxu1 }
 0x2f7   :  { %v2088_v25 = vpop.f32.mrb[230].mxu0  ;;  %v2377_v26 = vpop.f32.mrb[230].mxu1 }
 0x2f8   :  { %v2378_v59 = vadd.f32 %v2377_v26, %v2088_v25  ;;  %v2090_v27 = vpop.f32.mrb[231].mxu0  ;;  %v2379_v31 = vpop.f32.mrb[231].mxu1  ;;  %v2681_v60 = vadd.f32 %v3841_v34, %v2375_v22 }
 0x2fa   :  { %2745 = vst [vmem:[#allocation8 + $0x190] sm:$0xff] %v2681_v60  ;;  %v2682_v30 = vadd.f32 %v3841_v34, %v2378_v59 }
 0x2fc   :  { %2746 = vst [vmem:[#allocation8 + $0x198] sm:$0xff] %v2682_v30 }
 0x2fd   :  { %v2093_v33 = vpop.f32.mrb[232].mxu0  ;;  %v2382_v3 = vpop.f32.mrb[232].mxu1 }
 0x2fe   :  { %v2383_v7 = vadd.f32 %v2382_v3, %v2093_v33  ;;  %v2095_v32 = vpop.f32.mrb[233].mxu0  ;;  %v2384_v39 = vpop.f32.mrb[233].mxu1 }
 0x2ff   :  { %v2096_v37 = vpop.f32.mrb[234].mxu0  ;;  %v2385_v13 = vpop.f32.mrb[234].mxu1 }
 0x300   :  { %v2386_v43 = vadd.f32 %v2385_v13, %v2096_v37  ;;  %v2098_v8 = vpop.f32.mrb[235].mxu0  ;;  %v2387_v40 = vpop.f32.mrb[235].mxu1  ;;  %v2683_v10 = vadd.f32 %v3841_v34, %v2383_v7 }
 0x302   :  { %2747 = vst [vmem:[#allocation8 + $0x1a0] sm:$0xff] %v2683_v10  ;;  %v2684_v28 = vadd.f32 %v3841_v34, %v2386_v43  ;;  %v2934_v43 = vld [vmem:[%s3945_s4] ss:$0 sm:$0xff] }
 0x304   :  { %2748 = vst [vmem:[#allocation8 + $0x1a8] sm:$0xff] %v2684_v28 }
 0x305   :  { %v2101_v29 = vpop.f32.mrb[236].mxu0  ;;  %v2390_v44 = vpop.f32.mrb[236].mxu1 }
 0x306   :  { %v2391_v47 = vadd.f32 %v2390_v44, %v2101_v29  ;;  %v2103_v45 = vpop.f32.mrb[237].mxu0  ;;  %v2392_v14 = vpop.f32.mrb[237].mxu1 }
 0x307   :  { %v2104_v50 = vpop.f32.mrb[238].mxu0  ;;  %v2393_v20 = vpop.f32.mrb[238].mxu1 }
 0x308   :  { %v2394_v54 = vadd.f32 %v2393_v20, %v2104_v50  ;;  %v2106_v53 = vpop.f32.mrb[239].mxu0  ;;  %v2395_v55 = vpop.f32.mrb[239].mxu1  ;;  %v2685_v24 = vadd.f32 %v3841_v34, %v2391_v47 }
 0x30a   :  { %2749 = vst [vmem:[#allocation8 + $0x1b0] sm:$0xff] %v2685_v24  ;;  %v2686_v61 = vadd.f32 %v3841_v34, %v2394_v54 }
 0x30c   :  { %2750 = vst [vmem:[#allocation8 + $0x1b8] sm:$0xff] %v2686_v61 }
 0x30d   :  { %v2109_v46 = vpop.f32.mrb[240].mxu0  ;;  %v2398_v11 = vpop.f32.mrb[240].mxu1 }
 0x30e   :  { %v2399_v51 = vadd.f32 %v2398_v11, %v2109_v46  ;;  %v2111_v16 = vpop.f32.mrb[241].mxu0  ;;  %v2400_v36 = vpop.f32.mrb[241].mxu1 }
 0x30f   :  { %v2112_v35 = vpop.f32.mrb[242].mxu0  ;;  %v2401_v1 = vpop.f32.mrb[242].mxu1 }
 0x310   :  { %v2402_v2 = vadd.f32 %v2401_v1, %v2112_v35  ;;  %v2114_v38 = vpop.f32.mrb[243].mxu0  ;;  %v2403_v5 = vpop.f32.mrb[243].mxu1  ;;  %v2687_v41 = vadd.f32 %v3841_v34, %v2399_v51 }
 0x312   :  { %2751 = vst [vmem:[#allocation8 + $0x1c0] sm:$0xff] %v2687_v41  ;;  %v2688_v4 = vadd.f32 %v3841_v34, %v2402_v2 }
 0x314   :  { %2752 = vst [vmem:[#allocation8 + $0x1c8] sm:$0xff] %v2688_v4 }
 0x315   :  { %v2117_v19 = vpop.f32.mrb[244].mxu0  ;;  %v2406_v49 = vpop.f32.mrb[244].mxu1 }
 0x316   :  { %v2407_v23 = vadd.f32 %v2406_v49, %v2117_v19  ;;  %v2119_v0 = vpop.f32.mrb[245].mxu0  ;;  %v2408_v9 = vpop.f32.mrb[245].mxu1 }
 0x317   :  { %v2120_v6 = vpop.f32.mrb[246].mxu0  ;;  %v2409_v42 = vpop.f32.mrb[246].mxu1 }
 0x318   :  { %v2410_v12 = vadd.f32 %v2409_v42, %v2120_v6  ;;  %v2122_v48 = vpop.f32.mrb[247].mxu0  ;;  %v2411_v17 = vpop.f32.mrb[247].mxu1  ;;  %v2689_v15 = vadd.f32 %v3841_v34, %v2407_v23 }
 0x31a   :  { %2753 = vst [vmem:[#allocation8 + $0x1d0] sm:$0xff] %v2689_v15  ;;  %v2690_v18 = vadd.f32 %v3841_v34, %v2410_v12 }
 0x31c   :  { %2754 = vst [vmem:[#allocation8 + $0x1d8] sm:$0xff] %v2690_v18 }
 0x31d   :  { %v2125_v56 = vpop.f32.mrb[248].mxu0  ;;  %v2414_v21 = vpop.f32.mrb[248].mxu1 }
 0x31e   :  { %v2415_v58 = vadd.f32 %v2414_v21, %v2125_v56  ;;  %v2127_v62 = vpop.f32.mrb[249].mxu0  ;;  %v2416_v52 = vpop.f32.mrb[249].mxu1 }
 0x31f   :  { %v2128_v22 = vpop.f32.mrb[250].mxu0  ;;  %v2417_v57 = vpop.f32.mrb[250].mxu1 }
 0x320   :  { %v2418_v63 = vadd.f32 %v2417_v57, %v2128_v22  ;;  %v2130_v25 = vpop.f32.mrb[251].mxu0  ;;  %v2419_v26 = vpop.f32.mrb[251].mxu1  ;;  %v2691_v59 = vadd.f32 %v3841_v34, %v2415_v58 }
 0x322   :  { %2755 = vst [vmem:[#allocation8 + $0x1e0] sm:$0xff] %v2691_v59  ;;  %v2692_v27 = vadd.f32 %v3841_v34, %v2418_v63 }
 0x324   :  { %2756 = vst [vmem:[#allocation8 + $0x1e8] sm:$0xff] %v2692_v27 }
 0x325   :  { %v2133_v31 = vpop.f32.mrb[252].mxu0  ;;  %v2422_v60 = vpop.f32.mrb[252].mxu1 }
 0x326   :  { %v2423_v30 = vadd.f32 %v2422_v60, %v2133_v31  ;;  %v2135_v33 = vpop.f32.mrb[253].mxu0  ;;  %v2424_v3 = vpop.f32.mrb[253].mxu1 }
 0x327   :  { %v2136_v7 = vpop.f32.mrb[254].mxu0  ;;  %v2425_v32 = vpop.f32.mrb[254].mxu1 }
 0x328   :  { %v2426_v39 = vadd.f32 %v2425_v32, %v2136_v7  ;;  %v2138_v37 = vpop.f32.mrb[255].mxu0  ;;  %v2427_v13 = vpop.f32.mrb[255].mxu1  ;;  %v2693_v8 = vadd.f32 %v2934_v43, %v2423_v30 }
 0x32a   :  { %2757 = vst [vmem:[#allocation8 + $0x1f0] sm:$0xff] %v2693_v8  ;;  %v2694_v34 = vadd.f32 %v2934_v43, %v2426_v39 }
 0x32c   :  { %2758 = vst [vmem:[#allocation8 + $0x1f8] sm:$0xff] %v2694_v34 }
 0x32d   :  { %3012 = shalt.err (!%p3009_p0)
}
 0x32e   :  { %s3013_s18 = scalar_lea.hbm %s3946_s5, 8192 }
 0x32f   :  { %p3014_p1 = scmp.ne.s32.totalorder %s3946_s5, %s3013_s18  ;;  %p3017_p2 = scmp.lt.u32.totalorder %s3013_s18, %s3946_s5 }
 0x331   :  { %p3019_p3 = pnand %p3017_p2, %p3014_p1 }
 0x333   :  { %3022 = shalt.err (!%p3019_p3)
}
 0x334   :  { %2770 = dma.vmem_to_hbm [thread:$0]  %s2765_s11, 8192, %s3946_s5, [#allocation4], %s3033_s1, %s3033_s1, %s3034_s17  }
 0x335   :  { %3027 = dma.done.wait [#allocation4], 8192  }
 0x336   :  { %3028 = vsyncadd [#allocation4], 4294959104 }
 0x337   :  { %2774 = vsyncpa [#allocation3], 1 }
 0x338   :  { %2775 = vsyncpa [#allocation6], 1 }
 0x339   :  { %2776 = vsyncpa [#allocation4], 1 }

</bundles_post_ra>
